<compile_context>
chip_gen: v5e
topology: v5e:2x2
jax: 0.10.0
libtpu: 0.0.40
codegen_flags: <defaults>
</compile_context>

<pallas_src>
import functools
import math

import jax
import jax.numpy as jnp
from jax.experimental import pallas as pl
from jax.experimental.pallas import tpu as pltpu

EMBED_DIM = 128
HEADS = 4
HEAD_DIM = EMBED_DIM // HEADS
MLP_RATIO = 4
HIDDEN_DIM = EMBED_DIM * MLP_RATIO
LN_EPS = 1e-5


def _layernorm(x, gamma, beta):
    # x: (M, C) f32; gamma/beta: (C,) f32 — statistics kept in f32.
    mu = jnp.mean(x, axis=-1, keepdims=True)
    xc = x - mu
    var = jnp.mean(xc * xc, axis=-1, keepdims=True)
    return xc * jax.lax.rsqrt(var + LN_EPS) * gamma + beta


def _gelu(x, approximate):
    if approximate:
        # tanh approximation runs on the EUP slot (nearly free); slight numerics
        # deviation from nn.GELU's exact erf.
        return jax.nn.gelu(x, approximate=True)
    # nn.GELU default (approximate='none'): 0.5 * x * (1 + erf(x / sqrt(2)))
    return 0.5 * x * (1.0 + jax.lax.erf(x * (1.0 / math.sqrt(2.0))))


def encoder_layer_kernel(
    x_ref,
    g1_ref, b1_ref,
    wqkv_ref, bqkv_ref,
    wproj_ref, bproj_ref,
    g2_ref, b2_ref,
    w1_ref, bm1_ref,
    w2_ref, bm2_ref,
    o_ref,
    *,
    approximate_gelu,
):
    bt, n, c = x_ref.shape                                    # static block shape
    m = bt * n                                                # token rows this step
    x = x_ref[...].reshape(m, c).astype(jnp.float32)          # (M, C)

    # ---- norm1 (f32) ----
    h = _layernorm(x, g1_ref[0], b1_ref[0]).astype(jnp.bfloat16)

    # ---- fused QKV projection: bf16 x bf16 -> f32 accumulate ----
    # (1/sqrt(HEAD_DIM) already folded into the Q weight + bias columns host-side.)
    qkv = jnp.dot(h, wqkv_ref[...],
                  preferred_element_type=jnp.float32) + bqkv_ref[0]    # (M, 3C)

    def to_heads(t2d):
        # (M, C) -> (HEADS*bt, n, HEAD_DIM), head-major along axis 0.
        # Lane-aligned 32-wide reads + leading-dim reshapes + axis-0 concat (cheap).
        parts = [
            t2d[:, hd * HEAD_DIM:(hd + 1) * HEAD_DIM].reshape(bt, n, HEAD_DIM)
            for hd in range(HEADS)
        ]
        return jnp.concatenate(parts, axis=0)

    q = to_heads(qkv[:, :c]).astype(jnp.bfloat16)              # (G, n, Hd), G=HEADS*bt
    k = to_heads(qkv[:, c:2 * c]).astype(jnp.bfloat16)
    v = to_heads(qkv[:, 2 * c:]).astype(jnp.bfloat16)

    # ---- attention, batched over all (head, batch) pairs ----
    # TODO(synk): KV-tiled online-softmax (flash-style) for long N on v7x.
    s = jnp.einsum("gnd,gmd->gnm", q, k,
                   preferred_element_type=jnp.float32)          # (G, n, n)
    s = s - jnp.max(s, axis=-1, keepdims=True)
    p = jnp.exp(s)
    p = p * pl.reciprocal(jnp.sum(p, axis=-1, keepdims=True), approx=True)
    ctx = jnp.einsum("gnm,gmd->gnd", p.astype(jnp.bfloat16), v,
                     preferred_element_type=jnp.float32)        # (G, n, Hd)

    # ---- reassemble heads on the lane axis, then ONE K=128 output projection ----
    ctx_cat = jnp.concatenate(
        [ctx[hd * bt:(hd + 1) * bt].reshape(m, HEAD_DIM).astype(jnp.bfloat16)
         for hd in range(HEADS)],
        axis=-1,
    )                                                           # (M, C) bf16
    proj = jnp.dot(ctx_cat, wproj_ref[...],
                   preferred_element_type=jnp.float32)
    x1 = x + proj + bproj_ref[0]                                # residual in f32

    # ---- norm2 + MLP ----
    h2 = _layernorm(x1, g2_ref[0], b2_ref[0]).astype(jnp.bfloat16)
    mlp = jnp.dot(h2, w1_ref[...],
                  preferred_element_type=jnp.float32) + bm1_ref[0]     # (M, H)
    mlp = _gelu(mlp, approximate_gelu)
    mlp = jnp.dot(mlp.astype(jnp.bfloat16), w2_ref[...],
                  preferred_element_type=jnp.float32) + bm2_ref[0]     # (M, C)

    o_ref[...] = (x1 + mlp).reshape(bt, n, c).astype(o_ref.dtype)


def _pick_batch_tile(B, N, target_rows=512):
    """Fold batch into the matmul M dim. Prefer large M (amortizes per-step overhead,
    fills the 256-wide MXU), but once rows >= 256 prefer an even grid count >= 2 so
    v7x's two TensorCores stay balanced."""
    divisors = [d for d in range(1, B + 1) if B % d == 0]
    candidates = [d for d in divisors if d * N <= max(target_rows, N)] or [1]
    best = max(candidates)
    for d in sorted(candidates, reverse=True):
        steps = B // d
        if d * N >= 256 and steps >= 2 and steps % 2 == 0:
            return d
    return best


def _vmem_limit_bytes(bt, N):
    """Per-step working-set estimate with headroom, capped by physical VMEM."""
    M = bt * N
    G = HEADS * bt
    est = 0
    est += 2 * 2 * M * EMBED_DIM * 4              # double-buffered in/out slabs (f32)
    est += M * 3 * EMBED_DIM * 4                  # qkv accumulator (f32)
    est += 3 * G * N * HEAD_DIM * 2               # q, k, v (bf16)
    est += G * N * N * (4 + 2)                    # scores f32 + bf16 probabilities
    est += G * N * HEAD_DIM * 4                   # ctx (f32)
    est += M * EMBED_DIM * (2 + 4 + 4)            # ctx_cat bf16 + proj f32 + x1 f32
    est += M * HIDDEN_DIM * (4 + 2)               # MLP hidden f32 + bf16 copy
    wbytes = 2 * (EMBED_DIM * 3 * EMBED_DIM + EMBED_DIM * EMBED_DIM
                  + EMBED_DIM * HIDDEN_DIM + HIDDEN_DIM * EMBED_DIM)   # bf16 weights
    wbytes += 4 * (6 * EMBED_DIM + 3 * EMBED_DIM + HIDDEN_DIM)         # f32 biases/LN
    est += 2 * wbytes                             # weights double-buffered
    est = int(est * 1.5) + (4 << 20)              # relayout / spill headroom
    cap = 100 << 20                               # ~100 MiB usable on v5e/v6e
    try:
        cap = min(cap, int(pltpu.get_tpu_info().vmem_capacity_bytes * 0.85))
    except Exception:                             # pragma: no cover
        cap = 48 << 20                            # safe across all generations
    return int(min(max(est, 32 << 20), cap))


def transformer_encoder_layer(x, params, *, batch_tile=None, approximate_gelu=False):
    """x: (B, N, C) float32."""
    B, N, C = x.shape
    assert C == EMBED_DIM
    bt = batch_tile if batch_tile is not None else _pick_batch_tile(B, N)
    assert B % bt == 0

    bf16 = jnp.bfloat16
    scale = 1.0 / math.sqrt(HEAD_DIM)
    # One-time host-side fold of the softmax scale into the Q slice of W_qkv and b_qkv.
    wqkv = params["wqkv"].at[:, :EMBED_DIM].multiply(scale)
    bqkv = params["bqkv"].at[:, :EMBED_DIM].multiply(scale)

    # Weight matrices go to the MXU in bf16; biases / LN params stay f32.
    weights = [
        params["g1"], params["b1"],
        wqkv.astype(bf16), bqkv,
        params["wproj"].astype(bf16), params["bproj"],
        params["g2"], params["b2"],
        params["w1"].astype(bf16), params["bm1"],
        params["w2"].astype(bf16), params["bm2"],
    ]

    def full_spec(shape):
        nd = len(shape)
        return pl.BlockSpec(shape, lambda b, _nd=nd: (0,) * _nd)

    in_specs = [pl.BlockSpec((bt, N, C), lambda b: (b, 0, 0))] + [
        full_spec(w.shape) for w in weights
    ]

    kernel = functools.partial(encoder_layer_kernel, approximate_gelu=approximate_gelu)

    return pl.pallas_call(
        kernel,
        out_shape=jax.ShapeDtypeStruct((B, N, C), x.dtype),
        grid_spec=pltpu.PrefetchScalarGridSpec(
            num_scalar_prefetch=0,
            grid=(B // bt,),
            in_specs=in_specs,
            out_specs=pl.BlockSpec((bt, N, C), lambda b: (b, 0, 0)),
        ),
        compiler_params=pltpu.CompilerParams(
            dimension_semantics=("parallel",),
            vmem_limit_bytes=_vmem_limit_bytes(bt, N),
        ),
    )(x, *weights)


def init_params(key):
    ks = jax.random.split(key, 8)
    s = 0.02
    return {
        "g1": jnp.ones((1, EMBED_DIM), jnp.float32),
        "b1": jnp.zeros((1, EMBED_DIM), jnp.float32),
        # Linear weights stored as (in, out) == PyTorch weight.T
        "wqkv": s * jax.random.normal(ks[0], (EMBED_DIM, 3 * EMBED_DIM), jnp.float32),
        "bqkv": s * jax.random.normal(ks[1], (1, 3 * EMBED_DIM), jnp.float32),
        "wproj": s * jax.random.normal(ks[2], (EMBED_DIM, EMBED_DIM), jnp.float32),
        "bproj": s * jax.random.normal(ks[3], (1, EMBED_DIM), jnp.float32),
        "g2": jnp.ones((1, EMBED_DIM), jnp.float32),
        "b2": jnp.zeros((1, EMBED_DIM), jnp.float32),
        "w1": s * jax.random.normal(ks[4], (EMBED_DIM, HIDDEN_DIM), jnp.float32),
        "bm1": s * jax.random.normal(ks[5], (1, HIDDEN_DIM), jnp.float32),
        "w2": s * jax.random.normal(ks[6], (HIDDEN_DIM, EMBED_DIM), jnp.float32),
        "bm2": s * jax.random.normal(ks[7], (1, EMBED_DIM), jnp.float32),
    }


def reference(x, p):
    # Pure-JAX f32 reference mirroring the PyTorch forward (dropout = identity).
    def ln(x, g, b):
        mu = jnp.mean(x, axis=-1, keepdims=True)
        var = jnp.mean((x - mu) ** 2, axis=-1, keepdims=True)
        return (x - mu) / jnp.sqrt(var + LN_EPS) * g[0] + b[0]

    B, N, C = x.shape
    h = ln(x, p["g1"], p["b1"])
    qkv = h @ p["wqkv"] + p["bqkv"][0]                       # (B, N, 3C)
    qkv = qkv.reshape(B, N, 3, HEADS, HEAD_DIM).transpose(2, 0, 3, 1, 4)
    q, k, v = qkv[0], qkv[1], qkv[2]                         # (B, H, N, Hd)
    attn = jnp.einsum("bhnd,bhmd->bhnm", q, k) / math.sqrt(HEAD_DIM)
    attn = jax.nn.softmax(attn, axis=-1)
    out = jnp.einsum("bhnm,bhmd->bhnd", attn, v)
    out = out.transpose(0, 2, 1, 3).reshape(B, N, C)
    x1 = x + (out @ p["wproj"] + p["bproj"][0])
    h2 = ln(x1, p["g2"], p["b2"])
    m = h2 @ p["w1"] + p["bm1"][0]
    m = 0.5 * m * (1.0 + jax.lax.erf(m / math.sqrt(2.0)))
    m = m @ p["w2"] + p["bm2"][0]
    return x1 + m


if __name__ == "__main__":
    key = jax.random.PRNGKey(0)
    kx, kp = jax.random.split(key)

    B, N = 2, 8
    x = jax.random.normal(kx, (B, N, EMBED_DIM), jnp.float32)
    params = init_params(kp)

    out = transformer_encoder_layer(x, params)
    out = jax.block_until_ready(out)

    ref = reference(x, params)
    assert out.shape == (B, N, EMBED_DIM)
    # bf16 matmul operands (f32 accumulation) => slightly looser tolerance than pure f32.
    err = float(jnp.max(jnp.abs(out - ref)))
    assert jnp.allclose(out, ref, atol=2e-2, rtol=2e-2), err

    print("KERNEL_OK")
</pallas_src>

<mosaic_0001>
module attributes {stable_mosaic.version = 11 : i64} {
  func.func @encoder_layer_kernel(%arg0: i32, %arg1: memref<2x8x128xf32, #tpu.memory_space<vmem>>, %arg2: memref<1x128xf32, #tpu.memory_space<vmem>>, %arg3: memref<1x128xf32, #tpu.memory_space<vmem>>, %arg4: memref<128x384xbf16, #tpu.memory_space<vmem>>, %arg5: memref<1x384xf32, #tpu.memory_space<vmem>>, %arg6: memref<128x128xbf16, #tpu.memory_space<vmem>>, %arg7: memref<1x128xf32, #tpu.memory_space<vmem>>, %arg8: memref<1x128xf32, #tpu.memory_space<vmem>>, %arg9: memref<1x128xf32, #tpu.memory_space<vmem>>, %arg10: memref<128x512xbf16, #tpu.memory_space<vmem>>, %arg11: memref<1x512xf32, #tpu.memory_space<vmem>>, %arg12: memref<512x128xbf16, #tpu.memory_space<vmem>>, %arg13: memref<1x128xf32, #tpu.memory_space<vmem>>, %arg14: memref<2x8x128xf32, #tpu.memory_space<vmem>>) attributes {dimension_semantics = [#tpu.dimension_semantics<parallel>], iteration_bounds = array<i64: 1>, scalar_prefetch = 0 : i64, scratch_operands = 0 : i64, tpu.core_type = #tpu.core_type<tc>, window_params = [{transform_indices = @transform_0, window_bounds = array<i64: 2, 8, 128>}, {pipeline_mode = #tpu.pipeline_mode<synchronous>, transform_indices = @transform_1, window_bounds = array<i64: 1, 128>}, {pipeline_mode = #tpu.pipeline_mode<synchronous>, transform_indices = @transform_2, window_bounds = array<i64: 1, 128>}, {pipeline_mode = #tpu.pipeline_mode<synchronous>, transform_indices = @transform_3, window_bounds = array<i64: 128, 384>}, {pipeline_mode = #tpu.pipeline_mode<synchronous>, transform_indices = @transform_4, window_bounds = array<i64: 1, 384>}, {pipeline_mode = #tpu.pipeline_mode<synchronous>, transform_indices = @transform_5, window_bounds = array<i64: 128, 128>}, {pipeline_mode = #tpu.pipeline_mode<synchronous>, transform_indices = @transform_6, window_bounds = array<i64: 1, 128>}, {pipeline_mode = #tpu.pipeline_mode<synchronous>, transform_indices = @transform_7, window_bounds = array<i64: 1, 128>}, {pipeline_mode = #tpu.pipeline_mode<synchronous>, transform_indices = @transform_8, window_bounds = array<i64: 1, 128>}, {pipeline_mode = #tpu.pipeline_mode<synchronous>, transform_indices = @transform_9, window_bounds = array<i64: 128, 512>}, {pipeline_mode = #tpu.pipeline_mode<synchronous>, transform_indices = @transform_10, window_bounds = array<i64: 1, 512>}, {pipeline_mode = #tpu.pipeline_mode<synchronous>, transform_indices = @transform_11, window_bounds = array<i64: 512, 128>}, {pipeline_mode = #tpu.pipeline_mode<synchronous>, transform_indices = @transform_12, window_bounds = array<i64: 1, 128>}, {transform_indices = @transform_13, window_bounds = array<i64: 2, 8, 128>}]} {
    %c0 = arith.constant 0 : index
    %c0_0 = arith.constant 0 : index
    %c0_1 = arith.constant 0 : index
    %0 = vector.load %arg1[%c0, %c0_0, %c0_1] : memref<2x8x128xf32, #tpu.memory_space<vmem>>, vector<2x8x128xf32>
    %1 = vector.shape_cast %0 : vector<2x8x128xf32> to vector<16x128xf32>
    %c0_2 = arith.constant 0 : index
    %c0_3 = arith.constant 0 : index
    %2 = vector.load %arg2[%c0_2, %c0_3] : memref<1x128xf32, #tpu.memory_space<vmem>>, vector<1x128xf32>
    %3 = vector.shape_cast %2 : vector<1x128xf32> to vector<128xf32>
    %c0_4 = arith.constant 0 : index
    %c0_5 = arith.constant 0 : index
    %4 = vector.load %arg3[%c0_4, %c0_5] : memref<1x128xf32, #tpu.memory_space<vmem>>, vector<1x128xf32>
    %5 = vector.shape_cast %4 : vector<1x128xf32> to vector<128xf32>
    %cst = arith.constant dense<0.000000e+00> : vector<16xf32>
    %6 = vector.multi_reduction <add>, %1, %cst [1] : vector<16x128xf32> to vector<16xf32>
    %7 = vector.shape_cast %6 : vector<16xf32> to vector<16x1xf32>
    %cst_6 = arith.constant 1.280000e+02 : f32
    %8 = vector.broadcast %cst_6 : f32 to vector<16x1xf32>
    %9 = arith.divf %7, %8 : vector<16x1xf32>
    %10 = vector.broadcast %9 : vector<16x1xf32> to vector<16x128xf32>
    %11 = arith.subf %1, %10 : vector<16x128xf32>
    %12 = arith.mulf %11, %11 : vector<16x128xf32>
    %cst_7 = arith.constant dense<0.000000e+00> : vector<16xf32>
    %13 = vector.multi_reduction <add>, %12, %cst_7 [1] : vector<16x128xf32> to vector<16xf32>
    %14 = vector.shape_cast %13 : vector<16xf32> to vector<16x1xf32>
    %cst_8 = arith.constant 1.280000e+02 : f32
    %15 = vector.broadcast %cst_8 : f32 to vector<16x1xf32>
    %16 = arith.divf %14, %15 : vector<16x1xf32>
    %cst_9 = arith.constant 9.99999974E-6 : f32
    %17 = vector.broadcast %cst_9 : f32 to vector<16x1xf32>
    %18 = arith.addf %16, %17 : vector<16x1xf32>
    %19 = math.rsqrt %18 : vector<16x1xf32>
    %20 = vector.broadcast %19 : vector<16x1xf32> to vector<16x128xf32>
    %21 = arith.mulf %11, %20 : vector<16x128xf32>
    %22 = vector.shape_cast %3 : vector<128xf32> to vector<1x128xf32>
    %23 = vector.broadcast %22 : vector<1x128xf32> to vector<16x128xf32>
    %24 = arith.mulf %21, %23 : vector<16x128xf32>
    %25 = vector.shape_cast %5 : vector<128xf32> to vector<1x128xf32>
    %26 = vector.broadcast %25 : vector<1x128xf32> to vector<16x128xf32>
    %27 = arith.addf %24, %26 : vector<16x128xf32>
    %28 = arith.truncf %27 : vector<16x128xf32> to vector<16x128xbf16>
    %c0_10 = arith.constant 0 : index
    %c0_11 = arith.constant 0 : index
    %29 = vector.load %arg4[%c0_10, %c0_11] : memref<128x384xbf16, #tpu.memory_space<vmem>>, vector<128x384xbf16>
    %cst_12 = arith.constant dense<0.000000e+00> : vector<16x384xf32>
    %30 = tpu.matmul %28, %29, %cst_12 {dimension_numbers = #tpu.dot_dimension_numbers<[1], [0], [0], [1], [0, 0, 1, 1], [], []>} : vector<16x128xbf16>, vector<128x384xbf16>, vector<16x384xf32> -> vector<16x384xf32>
    %c0_13 = arith.constant 0 : index
    %c0_14 = arith.constant 0 : index
    %31 = vector.load %arg5[%c0_13, %c0_14] : memref<1x384xf32, #tpu.memory_space<vmem>>, vector<1x384xf32>
    %32 = vector.shape_cast %31 : vector<1x384xf32> to vector<384xf32>
    %33 = vector.shape_cast %32 : vector<384xf32> to vector<1x384xf32>
    %34 = vector.broadcast %33 : vector<1x384xf32> to vector<16x384xf32>
    %35 = arith.addf %30, %34 : vector<16x384xf32>
    %36 = vector.extract_strided_slice %35 {offsets = [0, 0], sizes = [16, 128], strides = [1, 1]} : vector<16x384xf32> to vector<16x128xf32>
    %37 = vector.extract_strided_slice %36 {offsets = [0, 0], sizes = [16, 32], strides = [1, 1]} : vector<16x128xf32> to vector<16x32xf32>
    %38 = vector.shape_cast %37 : vector<16x32xf32> to vector<2x8x32xf32>
    %39 = vector.extract_strided_slice %36 {offsets = [0, 32], sizes = [16, 32], strides = [1, 1]} : vector<16x128xf32> to vector<16x32xf32>
    %40 = vector.shape_cast %39 : vector<16x32xf32> to vector<2x8x32xf32>
    %41 = vector.extract_strided_slice %36 {offsets = [0, 64], sizes = [16, 32], strides = [1, 1]} : vector<16x128xf32> to vector<16x32xf32>
    %42 = vector.shape_cast %41 : vector<16x32xf32> to vector<2x8x32xf32>
    %43 = vector.extract_strided_slice %36 {offsets = [0, 96], sizes = [16, 32], strides = [1, 1]} : vector<16x128xf32> to vector<16x32xf32>
    %44 = vector.shape_cast %43 : vector<16x32xf32> to vector<2x8x32xf32>
    %45 = tpu.concatenate %38, %40, %42, %44 in 0 : vector<2x8x32xf32>, vector<2x8x32xf32>, vector<2x8x32xf32>, vector<2x8x32xf32> -> vector<8x8x32xf32>
    %46 = arith.truncf %45 : vector<8x8x32xf32> to vector<8x8x32xbf16>
    %47 = vector.extract_strided_slice %35 {offsets = [0, 128], sizes = [16, 128], strides = [1, 1]} : vector<16x384xf32> to vector<16x128xf32>
    %48 = vector.extract_strided_slice %47 {offsets = [0, 0], sizes = [16, 32], strides = [1, 1]} : vector<16x128xf32> to vector<16x32xf32>
    %49 = vector.shape_cast %48 : vector<16x32xf32> to vector<2x8x32xf32>
    %50 = vector.extract_strided_slice %47 {offsets = [0, 32], sizes = [16, 32], strides = [1, 1]} : vector<16x128xf32> to vector<16x32xf32>
    %51 = vector.shape_cast %50 : vector<16x32xf32> to vector<2x8x32xf32>
    %52 = vector.extract_strided_slice %47 {offsets = [0, 64], sizes = [16, 32], strides = [1, 1]} : vector<16x128xf32> to vector<16x32xf32>
    %53 = vector.shape_cast %52 : vector<16x32xf32> to vector<2x8x32xf32>
    %54 = vector.extract_strided_slice %47 {offsets = [0, 96], sizes = [16, 32], strides = [1, 1]} : vector<16x128xf32> to vector<16x32xf32>
    %55 = vector.shape_cast %54 : vector<16x32xf32> to vector<2x8x32xf32>
    %56 = tpu.concatenate %49, %51, %53, %55 in 0 : vector<2x8x32xf32>, vector<2x8x32xf32>, vector<2x8x32xf32>, vector<2x8x32xf32> -> vector<8x8x32xf32>
    %57 = arith.truncf %56 : vector<8x8x32xf32> to vector<8x8x32xbf16>
    %58 = vector.extract_strided_slice %35 {offsets = [0, 256], sizes = [16, 128], strides = [1, 1]} : vector<16x384xf32> to vector<16x128xf32>
    %59 = vector.extract_strided_slice %58 {offsets = [0, 0], sizes = [16, 32], strides = [1, 1]} : vector<16x128xf32> to vector<16x32xf32>
    %60 = vector.shape_cast %59 : vector<16x32xf32> to vector<2x8x32xf32>
    %61 = vector.extract_strided_slice %58 {offsets = [0, 32], sizes = [16, 32], strides = [1, 1]} : vector<16x128xf32> to vector<16x32xf32>
    %62 = vector.shape_cast %61 : vector<16x32xf32> to vector<2x8x32xf32>
    %63 = vector.extract_strided_slice %58 {offsets = [0, 64], sizes = [16, 32], strides = [1, 1]} : vector<16x128xf32> to vector<16x32xf32>
    %64 = vector.shape_cast %63 : vector<16x32xf32> to vector<2x8x32xf32>
    %65 = vector.extract_strided_slice %58 {offsets = [0, 96], sizes = [16, 32], strides = [1, 1]} : vector<16x128xf32> to vector<16x32xf32>
    %66 = vector.shape_cast %65 : vector<16x32xf32> to vector<2x8x32xf32>
    %67 = tpu.concatenate %60, %62, %64, %66 in 0 : vector<2x8x32xf32>, vector<2x8x32xf32>, vector<2x8x32xf32>, vector<2x8x32xf32> -> vector<8x8x32xf32>
    %68 = arith.truncf %67 : vector<8x8x32xf32> to vector<8x8x32xbf16>
    "tpu.trace_start"() <{level = 10 : i32, message = "gnd,gmd->gnm"}> : () -> ()
    %cst_15 = arith.constant dense<0.000000e+00> : vector<8x8x8xf32>
    %69 = tpu.matmul %46, %57, %cst_15 {dimension_numbers = #tpu.dot_dimension_numbers<[2], [2], [1], [1], [0, 0, 0, 1, 1, 1], [0], [0]>} : vector<8x8x32xbf16>, vector<8x8x32xbf16>, vector<8x8x8xf32> -> vector<8x8x8xf32>
    "tpu.trace_stop"() : () -> ()
    %cst_16 = arith.constant dense<0xFF800000> : vector<8x8xf32>
    %70 = vector.multi_reduction <maximumf>, %69, %cst_16 [2] : vector<8x8x8xf32> to vector<8x8xf32>
    %71 = vector.shape_cast %70 : vector<8x8xf32> to vector<8x8x1xf32>
    %72 = vector.broadcast %71 : vector<8x8x1xf32> to vector<8x8x8xf32>
    %73 = arith.subf %69, %72 : vector<8x8x8xf32>
    %74 = math.exp %73 : vector<8x8x8xf32>
    %cst_17 = arith.constant dense<0.000000e+00> : vector<8x8xf32>
    %75 = vector.multi_reduction <add>, %74, %cst_17 [2] : vector<8x8x8xf32> to vector<8x8xf32>
    %76 = vector.shape_cast %75 : vector<8x8xf32> to vector<8x8x1xf32>
    %77 = tpu.reciprocal %76 {approx = true} : vector<8x8x1xf32> -> vector<8x8x1xf32>
    %78 = vector.broadcast %77 : vector<8x8x1xf32> to vector<8x8x8xf32>
    %79 = arith.mulf %74, %78 : vector<8x8x8xf32>
    %80 = arith.truncf %79 : vector<8x8x8xf32> to vector<8x8x8xbf16>
    "tpu.trace_start"() <{level = 10 : i32, message = "gnm,gmd->gnd"}> : () -> ()
    %cst_18 = arith.constant dense<0.000000e+00> : vector<8x8x32xf32>
    %81 = tpu.matmul %80, %68, %cst_18 {dimension_numbers = #tpu.dot_dimension_numbers<[2], [1], [1], [2], [0, 0, 0, 1, 1, 2], [0], [0]>} : vector<8x8x8xbf16>, vector<8x8x32xbf16>, vector<8x8x32xf32> -> vector<8x8x32xf32>
    "tpu.trace_stop"() : () -> ()
    %82 = vector.extract_strided_slice %81 {offsets = [0, 0, 0], sizes = [2, 8, 32], strides = [1, 1, 1]} : vector<8x8x32xf32> to vector<2x8x32xf32>
    %83 = vector.shape_cast %82 : vector<2x8x32xf32> to vector<16x32xf32>
    %84 = arith.truncf %83 : vector<16x32xf32> to vector<16x32xbf16>
    %85 = vector.extract_strided_slice %81 {offsets = [2, 0, 0], sizes = [2, 8, 32], strides = [1, 1, 1]} : vector<8x8x32xf32> to vector<2x8x32xf32>
    %86 = vector.shape_cast %85 : vector<2x8x32xf32> to vector<16x32xf32>
    %87 = arith.truncf %86 : vector<16x32xf32> to vector<16x32xbf16>
    %88 = vector.extract_strided_slice %81 {offsets = [4, 0, 0], sizes = [2, 8, 32], strides = [1, 1, 1]} : vector<8x8x32xf32> to vector<2x8x32xf32>
    %89 = vector.shape_cast %88 : vector<2x8x32xf32> to vector<16x32xf32>
    %90 = arith.truncf %89 : vector<16x32xf32> to vector<16x32xbf16>
    %91 = vector.extract_strided_slice %81 {offsets = [6, 0, 0], sizes = [2, 8, 32], strides = [1, 1, 1]} : vector<8x8x32xf32> to vector<2x8x32xf32>
    %92 = vector.shape_cast %91 : vector<2x8x32xf32> to vector<16x32xf32>
    %93 = arith.truncf %92 : vector<16x32xf32> to vector<16x32xbf16>
    %94 = tpu.concatenate %84, %87, %90, %93 in 1 : vector<16x32xbf16>, vector<16x32xbf16>, vector<16x32xbf16>, vector<16x32xbf16> -> vector<16x128xbf16>
    %c0_19 = arith.constant 0 : index
    %c0_20 = arith.constant 0 : index
    %95 = vector.load %arg6[%c0_19, %c0_20] : memref<128x128xbf16, #tpu.memory_space<vmem>>, vector<128x128xbf16>
    %cst_21 = arith.constant dense<0.000000e+00> : vector<16x128xf32>
    %96 = tpu.matmul %94, %95, %cst_21 {dimension_numbers = #tpu.dot_dimension_numbers<[1], [0], [0], [1], [0, 0, 1, 1], [], []>} : vector<16x128xbf16>, vector<128x128xbf16>, vector<16x128xf32> -> vector<16x128xf32>
    %97 = arith.addf %1, %96 : vector<16x128xf32>
    %c0_22 = arith.constant 0 : index
    %c0_23 = arith.constant 0 : index
    %98 = vector.load %arg7[%c0_22, %c0_23] : memref<1x128xf32, #tpu.memory_space<vmem>>, vector<1x128xf32>
    %99 = vector.shape_cast %98 : vector<1x128xf32> to vector<128xf32>
    %100 = vector.shape_cast %99 : vector<128xf32> to vector<1x128xf32>
    %101 = vector.broadcast %100 : vector<1x128xf32> to vector<16x128xf32>
    %102 = arith.addf %97, %101 : vector<16x128xf32>
    %c0_24 = arith.constant 0 : index
    %c0_25 = arith.constant 0 : index
    %103 = vector.load %arg8[%c0_24, %c0_25] : memref<1x128xf32, #tpu.memory_space<vmem>>, vector<1x128xf32>
    %104 = vector.shape_cast %103 : vector<1x128xf32> to vector<128xf32>
    %c0_26 = arith.constant 0 : index
    %c0_27 = arith.constant 0 : index
    %105 = vector.load %arg9[%c0_26, %c0_27] : memref<1x128xf32, #tpu.memory_space<vmem>>, vector<1x128xf32>
    %106 = vector.shape_cast %105 : vector<1x128xf32> to vector<128xf32>
    %cst_28 = arith.constant dense<0.000000e+00> : vector<16xf32>
    %107 = vector.multi_reduction <add>, %102, %cst_28 [1] : vector<16x128xf32> to vector<16xf32>
    %108 = vector.shape_cast %107 : vector<16xf32> to vector<16x1xf32>
    %cst_29 = arith.constant 1.280000e+02 : f32
    %109 = vector.broadcast %cst_29 : f32 to vector<16x1xf32>
    %110 = arith.divf %108, %109 : vector<16x1xf32>
    %111 = vector.broadcast %110 : vector<16x1xf32> to vector<16x128xf32>
    %112 = arith.subf %102, %111 : vector<16x128xf32>
    %113 = arith.mulf %112, %112 : vector<16x128xf32>
    %cst_30 = arith.constant dense<0.000000e+00> : vector<16xf32>
    %114 = vector.multi_reduction <add>, %113, %cst_30 [1] : vector<16x128xf32> to vector<16xf32>
    %115 = vector.shape_cast %114 : vector<16xf32> to vector<16x1xf32>
    %cst_31 = arith.constant 1.280000e+02 : f32
    %116 = vector.broadcast %cst_31 : f32 to vector<16x1xf32>
    %117 = arith.divf %115, %116 : vector<16x1xf32>
    %cst_32 = arith.constant 9.99999974E-6 : f32
    %118 = vector.broadcast %cst_32 : f32 to vector<16x1xf32>
    %119 = arith.addf %117, %118 : vector<16x1xf32>
    %120 = math.rsqrt %119 : vector<16x1xf32>
    %121 = vector.broadcast %120 : vector<16x1xf32> to vector<16x128xf32>
    %122 = arith.mulf %112, %121 : vector<16x128xf32>
    %123 = vector.shape_cast %104 : vector<128xf32> to vector<1x128xf32>
    %124 = vector.broadcast %123 : vector<1x128xf32> to vector<16x128xf32>
    %125 = arith.mulf %122, %124 : vector<16x128xf32>
    %126 = vector.shape_cast %106 : vector<128xf32> to vector<1x128xf32>
    %127 = vector.broadcast %126 : vector<1x128xf32> to vector<16x128xf32>
    %128 = arith.addf %125, %127 : vector<16x128xf32>
    %129 = arith.truncf %128 : vector<16x128xf32> to vector<16x128xbf16>
    %c0_33 = arith.constant 0 : index
    %c0_34 = arith.constant 0 : index
    %130 = vector.load %arg10[%c0_33, %c0_34] : memref<128x512xbf16, #tpu.memory_space<vmem>>, vector<128x512xbf16>
    %cst_35 = arith.constant dense<0.000000e+00> : vector<16x512xf32>
    %131 = tpu.matmul %129, %130, %cst_35 {dimension_numbers = #tpu.dot_dimension_numbers<[1], [0], [0], [1], [0, 0, 1, 1], [], []>} : vector<16x128xbf16>, vector<128x512xbf16>, vector<16x512xf32> -> vector<16x512xf32>
    %c0_36 = arith.constant 0 : index
    %c0_37 = arith.constant 0 : index
    %132 = vector.load %arg11[%c0_36, %c0_37] : memref<1x512xf32, #tpu.memory_space<vmem>>, vector<1x512xf32>
    %133 = vector.shape_cast %132 : vector<1x512xf32> to vector<512xf32>
    %134 = vector.shape_cast %133 : vector<512xf32> to vector<1x512xf32>
    %135 = vector.broadcast %134 : vector<1x512xf32> to vector<16x512xf32>
    %136 = arith.addf %131, %135 : vector<16x512xf32>
    %cst_38 = arith.constant 5.000000e-01 : f32
    %137 = vector.broadcast %cst_38 : f32 to vector<16x512xf32>
    %138 = arith.mulf %137, %136 : vector<16x512xf32>
    %cst_39 = arith.constant 0.707106769 : f32
    %139 = vector.broadcast %cst_39 : f32 to vector<16x512xf32>
    %140 = arith.mulf %136, %139 : vector<16x512xf32>
    %141 = math.erf %140 : vector<16x512xf32>
    %cst_40 = arith.constant 1.000000e+00 : f32
    %142 = vector.broadcast %cst_40 : f32 to vector<16x512xf32>
    %143 = arith.addf %142, %141 : vector<16x512xf32>
    %144 = arith.mulf %138, %143 : vector<16x512xf32>
    %145 = arith.truncf %144 : vector<16x512xf32> to vector<16x512xbf16>
    %c0_41 = arith.constant 0 : index
    %c0_42 = arith.constant 0 : index
    %146 = vector.load %arg12[%c0_41, %c0_42] : memref<512x128xbf16, #tpu.memory_space<vmem>>, vector<512x128xbf16>
    %cst_43 = arith.constant dense<0.000000e+00> : vector<16x128xf32>
    %147 = tpu.matmul %145, %146, %cst_43 {dimension_numbers = #tpu.dot_dimension_numbers<[1], [0], [0], [1], [0, 0, 1, 1], [], []>} : vector<16x512xbf16>, vector<512x128xbf16>, vector<16x128xf32> -> vector<16x128xf32>
    %c0_44 = arith.constant 0 : index
    %c0_45 = arith.constant 0 : index
    %148 = vector.load %arg13[%c0_44, %c0_45] : memref<1x128xf32, #tpu.memory_space<vmem>>, vector<1x128xf32>
    %149 = vector.shape_cast %148 : vector<1x128xf32> to vector<128xf32>
    %150 = vector.shape_cast %149 : vector<128xf32> to vector<1x128xf32>
    %151 = vector.broadcast %150 : vector<1x128xf32> to vector<16x128xf32>
    %152 = arith.addf %147, %151 : vector<16x128xf32>
    %153 = arith.addf %102, %152 : vector<16x128xf32>
    %154 = vector.shape_cast %153 : vector<16x128xf32> to vector<2x8x128xf32>
    %c0_46 = arith.constant 0 : index
    %c0_47 = arith.constant 0 : index
    %c0_48 = arith.constant 0 : index
    %155 = vector.load %arg14[%c0_46, %c0_47, %c0_48] : memref<2x8x128xf32, #tpu.memory_space<vmem>>, vector<2x8x128xf32>
    tpu.vector_store %arg14[%c0_46, %c0_47, %c0_48], %154 {strides = array<i32>} : memref<2x8x128xf32, #tpu.memory_space<vmem>>, vector<2x8x128xf32>,
    return
  }
  func.func @transform_0(%arg0: i32) -> (i32, i32, i32) {
    %c0_i32 = arith.constant 0 : i32
    %c0_i32_0 = arith.constant 0 : i32
    %c0_i32_1 = arith.constant 0 : i32
    return %arg0, %c0_i32, %c0_i32_0 : i32, i32, i32
  }
  func.func @transform_1(%arg0: i32) -> (i32, i32) {
    %c0_i32 = arith.constant 0 : i32
    %c0_i32_0 = arith.constant 0 : i32
    %c0_i32_1 = arith.constant 0 : i32
    return %c0_i32, %c0_i32_0 : i32, i32
  }
  func.func @transform_2(%arg0: i32) -> (i32, i32) {
    %c0_i32 = arith.constant 0 : i32
    %c0_i32_0 = arith.constant 0 : i32
    %c0_i32_1 = arith.constant 0 : i32
    return %c0_i32, %c0_i32_0 : i32, i32
  }
  func.func @transform_3(%arg0: i32) -> (i32, i32) {
    %c0_i32 = arith.constant 0 : i32
    %c0_i32_0 = arith.constant 0 : i32
    %c0_i32_1 = arith.constant 0 : i32
    return %c0_i32, %c0_i32_0 : i32, i32
  }
  func.func @transform_4(%arg0: i32) -> (i32, i32) {
    %c0_i32 = arith.constant 0 : i32
    %c0_i32_0 = arith.constant 0 : i32
    %c0_i32_1 = arith.constant 0 : i32
    return %c0_i32, %c0_i32_0 : i32, i32
  }
  func.func @transform_5(%arg0: i32) -> (i32, i32) {
    %c0_i32 = arith.constant 0 : i32
    %c0_i32_0 = arith.constant 0 : i32
    %c0_i32_1 = arith.constant 0 : i32
    return %c0_i32, %c0_i32_0 : i32, i32
  }
  func.func @transform_6(%arg0: i32) -> (i32, i32) {
    %c0_i32 = arith.constant 0 : i32
    %c0_i32_0 = arith.constant 0 : i32
    %c0_i32_1 = arith.constant 0 : i32
    return %c0_i32, %c0_i32_0 : i32, i32
  }
  func.func @transform_7(%arg0: i32) -> (i32, i32) {
    %c0_i32 = arith.constant 0 : i32
    %c0_i32_0 = arith.constant 0 : i32
    %c0_i32_1 = arith.constant 0 : i32
    return %c0_i32, %c0_i32_0 : i32, i32
  }
  func.func @transform_8(%arg0: i32) -> (i32, i32) {
    %c0_i32 = arith.constant 0 : i32
    %c0_i32_0 = arith.constant 0 : i32
    %c0_i32_1 = arith.constant 0 : i32
    return %c0_i32, %c0_i32_0 : i32, i32
  }
  func.func @transform_9(%arg0: i32) -> (i32, i32) {
    %c0_i32 = arith.constant 0 : i32
    %c0_i32_0 = arith.constant 0 : i32
    %c0_i32_1 = arith.constant 0 : i32
    return %c0_i32, %c0_i32_0 : i32, i32
  }
  func.func @transform_10(%arg0: i32) -> (i32, i32) {
    %c0_i32 = arith.constant 0 : i32
    %c0_i32_0 = arith.constant 0 : i32
    %c0_i32_1 = arith.constant 0 : i32
    return %c0_i32, %c0_i32_0 : i32, i32
  }
  func.func @transform_11(%arg0: i32) -> (i32, i32) {
    %c0_i32 = arith.constant 0 : i32
    %c0_i32_0 = arith.constant 0 : i32
    %c0_i32_1 = arith.constant 0 : i32
    return %c0_i32, %c0_i32_0 : i32, i32
  }
  func.func @transform_12(%arg0: i32) -> (i32, i32) {
    %c0_i32 = arith.constant 0 : i32
    %c0_i32_0 = arith.constant 0 : i32
    %c0_i32_1 = arith.constant 0 : i32
    return %c0_i32, %c0_i32_0 : i32, i32
  }
  func.func @transform_13(%arg0: i32) -> (i32, i32, i32) {
    %c0_i32 = arith.constant 0 : i32
    %c0_i32_0 = arith.constant 0 : i32
    %c0_i32_1 = arith.constant 0 : i32
    return %arg0, %c0_i32, %c0_i32_0 : i32, i32, i32
  }
}

</mosaic_0001>

<bundles_post_ra>
// kernel: tpu_custom_call.1
= control target key start
LH: loop header
LB: loop body
LE: loop exit
PB: predicated region body
PF: predicated region fallthrough
CT: control target
= control target key end

     0   :  { %18 = vsyncpa [#allocation3], 0  ;;  %s3633_s0 = inlined_call_operand.hbm [shape: f32[2,8,128], index: 0, kind: input, shape index: {}]   ;;  %s3634_s1 = inlined_call_operand.hbm [shape: f32[1,128], index: 1, kind: input, shape index: {}]   ;;  %s3635_s2 = inlined_call_operand.hbm [shape: f32[1,128], index: 2, kind: input, shape index: {}]   ;;  %s3636_s3 = inlined_call_operand.hbm [shape: bf16[128,384], index: 3, kind: input, shape index: {}]   ;;  %s3637_s4 = inlined_call_operand.vmem [shape: f32[1,384], index: 4, kind: input, shape index: {}]   ;;  %s3638_s5 = inlined_call_operand.hbm [shape: bf16[128,128], index: 5, kind: input, shape index: {}]   ;;  %s3639_s6 = inlined_call_operand.hbm [shape: f32[1,128], index: 6, kind: input, shape index: {}]   ;;  %s3640_s7 = inlined_call_operand.hbm [shape: f32[1,128], index: 7, kind: input, shape index: {}]   ;;  %s3641_s8 = inlined_call_operand.hbm [shape: f32[1,128], index: 8, kind: input, shape index: {}]   ;;  %s3642_s9 = inlined_call_operand.hbm [shape: bf16[128,512], index: 9, kind: input, shape index: {}]   ;;  %s3643_s10 = inlined_call_operand.vmem [shape: f32[1,512], index: 10, kind: input, shape index: {}]   ;;  %s3644_s11 = inlined_call_operand.hbm [shape: bf16[512,128], index: 11, kind: input, shape index: {}]   ;;  %s3645_s12 = inlined_call_operand.vmem [shape: f32[1,128], index: 12, kind: input, shape index: {}]   ;;  %s3646_s13 = inlined_call_operand.hbm [shape: f32[2,8,128], index: 13, kind: output, shape index: {}]  }
   0x1   :  { %19 = vsyncpa [#allocation6], 0 }
   0x2   :  { %20 = vsyncpa [#allocation9], 0 }
   0x3   :  { %21 = vsyncpa [#allocation12], 0 }
   0x4   :  { %22 = vsyncpa [#allocation15], 0 }
   0x5   :  { %23 = vsyncpa [#allocation18], 0  ;;  %s43_s27 = sshll.u32 %s3634_s1, 4  ;;  %s44_s27 = int_to_ptr.hbm [resolvable:$true] %s43_s27 }
   0x6   :  { %24 = vsyncpa [#allocation4], 0  ;;  %s2975_s28 = smov [#allocation5]   ;;  %s64_s15 = sshll.u32 %s3636_s3, 4  ;;  %s65_s15 = int_to_ptr.hbm [resolvable:$true] %s64_s15 }
   0x7   :  { %s45_s29 = sshll.u32 %s2975_s28, 4  ;;  %s2976_s16 = smov [#allocation8]   ;;  %s46_s29 = int_to_ptr.vmem [resolvable:$true] %s45_s29 }
   0x8   :  { %48 = dma.hbm_to_vmem [thread:$0]  %s44_s27, 16, %s46_s29, [#allocation6]  }
   0x9   :  { %s66_s17 = sshll.u32 %s2976_s16, 4  ;;  %s2977_s18 = smov 192   ;;  %s67_s17 = int_to_ptr.vmem [resolvable:$true] %s66_s17 }
   0xa   :  { %s2978_s19 = smov 12   ;;  %s93_s1 = sshll.u32 %s3639_s6, 4  ;;  %s94_s1 = int_to_ptr.hbm [resolvable:$true] %s93_s1 }
   0xb   :  { %72 = dma.hbm_to_vmem [thread:$0]  %s65_s15, 3072, %s67_s17, [#allocation9], %s2977_s18, %s2977_s18, %s2978_s19  }
   0xc   :  { %s2979_s22 = smov [#allocation11]   ;;  %s115_s3 = sshll.u32 %s3641_s8, 4  ;;  %s116_s3 = int_to_ptr.hbm [resolvable:$true] %s115_s3 }
   0xd   :  { %s95_s23 = sshll.u32 %s2979_s22, 4  ;;  %s2980_s26 = smov [#allocation14]   ;;  %s96_s23 = int_to_ptr.vmem [resolvable:$true] %s95_s23 }
   0xe   :  { %98 = dma.hbm_to_vmem [thread:$0]  %s94_s1, 16, %s96_s23, [#allocation12]  }
   0xf   :  { %s117_s27 = sshll.u32 %s2980_s26, 4  ;;  %s29_s30 = sshll.u32 %s3633_s0, 4  ;;  %s118_s27 = int_to_ptr.vmem [resolvable:$true] %s117_s27  ;;  %s30_s30 = int_to_ptr.hbm [resolvable:$true] %s29_s30 }
  0x10   :  { %120 = dma.hbm_to_vmem [thread:$0]  %s116_s3, 16, %s118_s27, [#allocation15]  }
  0x11   :  { %s2981_s6 = smov [#allocation2]   ;;  %s54_s17 = sshll.u32 %s3635_s2, 4  ;;  %s55_s17 = int_to_ptr.hbm [resolvable:$true] %s54_s17 }
  0x12   :  { %s31_s14 = sshll.u32 %s2981_s6, 4  ;;  %s2982_s18 = smov 128   ;;  %s32_s14 = int_to_ptr.vmem [resolvable:$true] %s31_s14 }
  0x13   :  { %s2983_s8 = smov 8   ;;  %s2984_s19 = smov [#allocation7]  }
  0x14   :  { %37 = dma.hbm_to_vmem [thread:$0]  %s30_s30, 256, %s32_s14, [#allocation3], %s2982_s18, %s2982_s18, %s2983_s8  }
  0x15   :  { %s56_s20 = sshll.u32 %s2984_s19, 4  ;;  %s79_s1 = sshll.u32 %s3638_s5, 4  ;;  %s57_s20 = int_to_ptr.vmem [resolvable:$true] %s56_s20  ;;  %s80_s1 = int_to_ptr.hbm [resolvable:$true] %s79_s1 }
  0x16   :  { %59 = dma.hbm_to_vmem [thread:$0]  %s55_s17, 16, %s57_s20, [#allocation6]  }
  0x17   :  { %s2985_s22 = smov [#allocation10]   ;;  %s104_s25 = sshll.u32 %s3640_s7, 4  ;;  %s105_s25 = int_to_ptr.hbm [resolvable:$true] %s104_s25 }
  0x18   :  { %s81_s23 = sshll.u32 %s2985_s22, 4  ;;  %s2986_s3 = smov 64   ;;  %s82_s23 = int_to_ptr.vmem [resolvable:$true] %s81_s23 }
  0x19   :  { %s2987_s26 = smov 4   ;;  %s2988_s27 = smov [#allocation13]  }
  0x1a   :  { %87 = dma.hbm_to_vmem [thread:$0]  %s80_s1, 1024, %s82_s23, [#allocation9], %s2986_s3, %s2986_s3, %s2987_s26  }
  0x1b   :  { %s106_s28 = sshll.u32 %s2988_s27, 4  ;;  %s125_s30 = sshll.u32 %s3642_s9, 4  ;;  %s107_s28 = int_to_ptr.vmem [resolvable:$true] %s106_s28  ;;  %s126_s30 = int_to_ptr.hbm [resolvable:$true] %s125_s30 }
  0x1c   :  { %109 = dma.hbm_to_vmem [thread:$0]  %s105_s25, 16, %s107_s28, [#allocation12]  }
  0x1d   :  { %s2989_s6 = smov [#allocation16]   ;;  %s140_s16 = sshll.u32 %s3644_s11, 4  ;;  %s141_s16 = int_to_ptr.hbm [resolvable:$true] %s140_s16 }
  0x1e   :  { %s127_s14 = sshll.u32 %s2989_s6, 4  ;;  %s2990_s17 = smov 256   ;;  %s128_s14 = int_to_ptr.vmem [resolvable:$true] %s127_s14 }
  0x1f   :  { %s2991_s19 = smov 16   ;;  %s2992_s20 = smov [#allocation17]  }
  0x20   :  { %133 = dma.hbm_to_vmem [thread:$0]  %s126_s30, 4096, %s128_s14, [#allocation15], %s2990_s17, %s2990_s17, %s2991_s19  }
  0x21   :  { %s142_s0 = sshll.u32 %s2992_s20, 4  ;;  %s143_s0 = int_to_ptr.vmem [resolvable:$true] %s142_s0 }
  0x22   :  { %148 = dma.hbm_to_vmem [thread:$0]  %s141_s16, 4096, %s143_s0, [#allocation18], %s2986_s3, %s2986_s3, %s2987_s26  }
  0x23   :  { %2961 = dma.done.wait [#allocation3], 256  }
  0x24   :  { %2962 = vsyncadd [#allocation3], 4294967040 }
  0x25   :  { %2963 = dma.done.wait [#allocation6], 32  }
  0x26   :  { %2964 = vsyncadd [#allocation6], 4294967264 }
  0x27   :  { %2965 = dma.done.wait [#allocation9], 4096  }
  0x28   :  { %2966 = vsyncadd [#allocation9], 4294963200 }
  0x29   :  { %2967 = dma.done.wait [#allocation12], 32  }
  0x2a   :  { %2968 = vsyncadd [#allocation12], 4294967264 }
  0x2b   :  { %2969 = dma.done.wait [#allocation15], 4112  }
  0x2c   :  { %2970 = vsyncadd [#allocation15], 4294963184 }
  0x2d   :  { %2971 = dma.done.wait [#allocation18], 4096  }
  0x2e   :  { %2972 = vsyncadd [#allocation18], 4294963200  ;;  %v3104_v0 = vld [vmem:[#allocation2] sm:$0xff]  ;;  %v3107_v1 = vld [vmem:[#allocation2 + $0x8] sm:$0xff]  ;;  %v2993_v2 = vmov 128.0   ;;  %vm548_vm7 = vcmask 261120  }
  0x2f   :  { %196 = vadd.xlane.f32.xlu0 %v3104_v0  ;;  %2639 = vrcp.f32 %v2993_v2  ;;  %v2178_v17 = vld [vmem:[#allocation8 + $0xa8] sm:$0xf]  ;;  %v2522_v18 = vld [vmem:[#allocation8 + $0xb0] sm:$0xf0]  ;;  %v2521_v19 = vld [vmem:[#allocation8 + $0xac] sm:$0xf] }
  0x30   :  { %v2179_v20 = vor.u32 %v2522_v18, %v2178_v17  ;;  %v2180_v21 = vld [vmem:[#allocation8 + $0xb4] sm:$0xf0]  ;;  %v2186_v22 = vld [vmem:[#allocation8 + $0xb0] sm:$0xf]  ;;  %v2523_v23 = vld [vmem:[#allocation8 + $0xb8] sm:$0xf0] }
  0x31   :  { %v2183_v24 = vor.u32 %v2521_v19, %v2180_v21  ;;  %v2187_v25 = vor.u32 %v2523_v23, %v2186_v22  ;;  %v2166_v26 = vld [vmem:[#allocation8 + $0x90] sm:$0xf]  ;;  %v2519_v27 = vld [vmem:[#allocation8 + $0x98] sm:$0xf0]  ;;  %v2518_v28 = vld [vmem:[#allocation8 + $0x94] sm:$0xf] }
  0x32   :  { %422 = vmatpush.bf16.msra.mxu0 %v2179_v20  ;;  %v2167_v29 = vor.u32 %v2519_v27, %v2166_v26  ;;  %v2168_v30 = vld [vmem:[#allocation8 + $0x9c] sm:$0xf0]  ;;  %v2174_v31 = vld [vmem:[#allocation8 + $0x98] sm:$0xf]  ;;  %v2520_v32 = vld [vmem:[#allocation8 + $0xa0] sm:$0xf0] }
  0x33   :  { %436 = vmatpush.bf16.msra.mxu1 %v2183_v24  ;;  %450 = vmatpush.bf16.msra.mxu2 %v2187_v25  ;;  %v2171_v33 = vor.u32 %v2518_v28, %v2168_v30  ;;  %v2175_v34 = vor.u32 %v2520_v32, %v2174_v31  ;;  %v2154_v35 = vld [vmem:[#allocation8 + $0x78] sm:$0xf]  ;;  %v2516_v36 = vld [vmem:[#allocation8 + $0x80] sm:$0xf0]  ;;  %v2515_v37 = vld [vmem:[#allocation8 + $0x7c] sm:$0xf] }
  0x34   :  { %v2155_v38 = vor.u32 %v2516_v36, %v2154_v35  ;;  %v2156_v39 = vld [vmem:[#allocation8 + $0x84] sm:$0xf0]  ;;  %v2162_v40 = vld [vmem:[#allocation8 + $0x80] sm:$0xf]  ;;  %v2517_v41 = vld [vmem:[#allocation8 + $0x88] sm:$0xf0] }
  0x35   :  { %v2640_v3 = vpop.eup %2639  ;;  %v2159_v42 = vor.u32 %v2515_v37, %v2156_v39  ;;  %v2163_v43 = vor.u32 %v2517_v41, %v2162_v40  ;;  %v2142_v44 = vld [vmem:[#allocation8 + $0x60] sm:$0xf]  ;;  %v2513_v45 = vld [vmem:[#allocation8 + $0x68] sm:$0xf0]  ;;  %v2512_v46 = vld [vmem:[#allocation8 + $0x64] sm:$0xf] }
  0x36   :  { %v201_v4 = vmul.f32 128.0, %v2640_v3  ;;  %vm205_vm0 = vweird.f32 %v2640_v3  ;;  %423 = vmatpush.bf16.msra.mxu0 %v2167_v29  ;;  %v2143_v47 = vor.u32 %v2513_v45, %v2142_v44  ;;  %v2144_v48 = vld [vmem:[#allocation8 + $0x6c] sm:$0xf0]  ;;  %v2150_v49 = vld [vmem:[#allocation8 + $0x68] sm:$0xf]  ;;  %vm801_vm8 = vcmask 1043456  }
  0x37   :  { %198 = vadd.xlane.f32.xlu0 %v3107_v1  ;;  %437 = vmatpush.bf16.msra.mxu1 %v2171_v33  ;;  %v2514_v50 = vld [vmem:[#allocation8 + $0x70] sm:$0xf0]  ;;  %v2147_v51 = vor.u32 %v2512_v46, %v2144_v48  ;;  %v2130_v53 = vld [vmem:[#allocation8 + $0x48] sm:$0xf]  ;;  %v2509_v55 = vld [vmem:[#allocation8 + $0x4c] sm:$0xf] }
  0x38   :  { %v202_v5 = vsub.f32 1.0, %v201_v4  ;;  %451 = vmatpush.bf16.msra.mxu2 %v2175_v34  ;;  %v2151_v52 = vor.u32 %v2514_v50, %v2150_v49  ;;  %v2510_v54 = vld [vmem:[#allocation8 + $0x50] sm:$0xf0]  ;;  %v2132_v57 = vld [vmem:[#allocation8 + $0x54] sm:$0xf0]  ;;  %s2995_s21 = smov 32  }
  0x39   :  { %v2131_v56 = vor.u32 %v2510_v54, %v2130_v53  ;;  %v2138_v58 = vld [vmem:[#allocation8 + $0x50] sm:$0xf]  ;;  %v2511_v59 = vld [vmem:[#allocation8 + $0x58] sm:$0xf0]  ;;  %v2135_v60 = vor.u32 %v2509_v55, %v2132_v57  ;;  %v2506_v2 = vld [vmem:[#allocation8 + $0x34] sm:$0xf] }
  0x3a   :  { %v203_v6 = vmul.f32 %v2640_v3, %v202_v5  ;;  %424 = vmatpush.bf16.msra.mxu0 %v2155_v38  ;;  %v2139_v61 = vor.u32 %v2511_v59, %v2138_v58  ;;  %v2118_v62 = vld [vmem:[#allocation8 + $0x30] sm:$0xf]  ;;  %v2507_v63 = vld [vmem:[#allocation8 + $0x38] sm:$0xf0]  ;;  %v2120_v4 = vld [vmem:[#allocation8 + $0x3c] sm:$0xf0] }
  0x3b   :  { %438 = vmatpush.bf16.msra.mxu1 %v2159_v42  ;;  %v2126_v5 = vld [vmem:[#allocation8 + $0x38] sm:$0xf]  ;;  %v2114_v17 = vld [vmem:[#allocation8 + $0x20] sm:$0xf]  ;;  %v2505_v18 = vld [vmem:[#allocation8 + $0x28] sm:$0xf0] }
  0x3c   :  { %v204_v7 = vadd.f32 %v2640_v3, %v203_v6  ;;  %452 = vmatpush.bf16.msra.mxu2 %v2163_v43  ;;  %v2508_v6 = vld [vmem:[#allocation8 + $0x40] sm:$0xf0]  ;;  %v2115_v20 = vor.u32 %v2505_v18, %v2114_v17  ;;  %v2094_v21 = vld [vmem:[#allocation8] sm:$0xf]  ;;  %v2501_v22 = vld [vmem:[#allocation8 + $0x8] sm:$0xf0] }
  0x3d   :  { %v2500_v23 = vld [vmem:[#allocation8 + $0x4] sm:$0xf]  ;;  %v2095_v25 = vor.u32 %v2501_v22, %v2094_v21  ;;  %v2096_v26 = vld [vmem:[#allocation8 + $0xc] sm:$0xf0]  ;;  %v2102_v27 = vld [vmem:[#allocation8 + $0x8] sm:$0xf] }
  0x3e   :  { %v3110_v8 = vsel %vm205_vm0, %v2640_v3, %v204_v7  ;;  %425 = vmatpush.bf16.msra.mxu0 %v2143_v47  ;;  %v2119_v3 = vor.u32 %v2507_v63, %v2118_v62  ;;  %v2123_v7 = vor.u32 %v2506_v2, %v2120_v4  ;;  %v2502_v28 = vld [vmem:[#allocation8 + $0x10] sm:$0xf0]  ;;  %v2099_v30 = vor.u32 %v2500_v23, %v2096_v26  ;;  %v2633_v49 = vld [vmem:[#allocation5] ss:$0 sm:$0xff]  ;;  %v2634_v54 = vld [vmem:[#allocation7] ss:$0 sm:$0xff] }
  0x3f   :  { %439 = vmatpush.bf16.msra.mxu1 %v2147_v51  ;;  %v2103_v31 = vor.u32 %v2502_v28, %v2102_v27  ;;  %vm701_vm9 = vcmask 64512   ;;  %vm988_vm10 = vcmask 523264   ;;  %vm991_vm11 = vcmask 785408   ;;  %s2996_s2 = smov [#allocation19]  }
  0x40   :  { %453 = vmatpush.bf16.msra.mxu2 %v2151_v52  ;;  %s2072_s24 = sshll.u32 %s2996_s2, 4  ;;  %s2073_s24 = int_to_ptr.vmem [resolvable:$true] %s2072_s24 }
  0x42   :  { %426 = vmatpush.bf16.msra.mxu0 %v2131_v56 }
  0x43   :  { %440 = vmatpush.bf16.msra.mxu1 %v2135_v60 }
  0x44   :  { %454 = vmatpush.bf16.msra.mxu2 %v2139_v61 }
  0x46   :  { %427 = vmatpush.bf16.msra.mxu0 %v2119_v3 }
  0x47   :  { %441 = vmatpush.bf16.msra.mxu1 %v2123_v7 }
  0xa2   :  { %v197_v9 = vpop.xlane.xlu0 %196 }
  0xa3   :  { %v207_v10 = vmul.f32 %v3110_v8, %v197_v9  ;;  %v2127_v9 = vor.u32 %v2508_v6, %v2126_v5 }
  0xa5   :  { %v3114_v11 = vsub.f32 %v3104_v0, %v207_v10  ;;  %455 = vmatpush.bf16.msra.mxu2 %v2127_v9  ;;  %v2106_v10 = vld [vmem:[#allocation8 + $0x18] sm:$0xf] }
  0xa7   :  { %v211_v12 = vmul.f32 %v3114_v11, %v3114_v11 }
  0xa9   :  { %213 = vadd.xlane.f32.xlu1 %v211_v12  ;;  %v2504_v12 = vld [vmem:[#allocation8 + $0x20] sm:$0xf0]  ;;  %456 = vmatpush.bf16.msra.mxu2 %v2115_v20 }
  0xaa   :  { %v199_v13 = vpop.xlane.xlu0 %198 }
  0xab   :  { %v208_v14 = vmul.f32 %v3110_v8, %v199_v13  ;;  %v2503_v13 = vld [vmem:[#allocation8 + $0x1c] sm:$0xf] }
  0xad   :  { %v3120_v15 = vsub.f32 %v3107_v1, %v208_v14  ;;  %v2107_v14 = vor.u32 %v2504_v12, %v2106_v10  ;;  %457 = vmatpush.bf16.msra.mxu2 %v2103_v31 }
  0xaf   :  { %v212_v16 = vmul.f32 %v3120_v15, %v3120_v15  ;;  %428 = vmatpush.bf16.msra.mxu0 %v2107_v14 }
  0xb1   :  { %215 = vadd.xlane.f32.xlu1 %v212_v16  ;;  %v2108_v16 = vld [vmem:[#allocation8 + $0x24] sm:$0xf0] }
  0xb2   :  { %v2111_v19 = vor.u32 %v2503_v13, %v2108_v16 }
  0xb3   :  { %429 = vmatpush.bf16.msra.mxu0 %v2095_v25 }
  0xb4   :  { %442 = vmatpush.bf16.msra.mxu1 %v2111_v19 }
  0xb8   :  { %443 = vmatpush.bf16.msra.mxu1 %v2099_v30 }
 0x11c   :  { %v214_v24 = vpop.xlane.xlu1 %213 }
 0x11d   :  { %v217_v29 = vmul.f32 %v214_v24, %v3110_v8 }
 0x11f   :  { %v219_v32 = vadd.f32 1e-05, %v217_v29 }
 0x121   :  { %2641 = vrsqrt.f32 %v219_v32  ;;  %vm227_vm2 = vweird.f32 %v219_v32 }
 0x124   :  { %v216_v33 = vpop.xlane.xlu1 %215 }
 0x125   :  { %v218_v34 = vmul.f32 %v216_v33, %v3110_v8 }
 0x127   :  { %v2642_v35 = vpop.eup %2641  ;;  %v220_v36 = vadd.f32 1e-05, %v218_v34 }
 0x128   :  { %v222_v37 = vmul.f32 %v2642_v35, %v219_v32  ;;  %vm228_vm1 = vweird.f32 %v2642_v35 }
 0x129   :  { %2643 = vrsqrt.f32 %v220_v36  ;;  %vm229_vm3 = vmor %vm227_vm2, %vm228_vm1  ;;  %vm237_vm5 = vweird.f32 %v220_v36 }
 0x12a   :  { %v223_v38 = vmul.f32 %v2642_v35, %v222_v37 }
 0x12c   :  { %v224_v39 = vmul.f32 0.5, %v223_v38 }
 0x12e   :  { %v225_v40 = vsub.f32 1.5, %v224_v39 }
 0x12f   :  { %v2644_v41 = vpop.eup %2643 }
 0x130   :  { %v226_v42 = vmul.f32 %v2642_v35, %v225_v40  ;;  %v232_v43 = vmul.f32 %v2644_v41, %v220_v36  ;;  %vm238_vm4 = vweird.f32 %v2644_v41 }
 0x131   :  { %vm239_vm6 = vmor %vm237_vm5, %vm238_vm4 }
 0x132   :  { %v233_v44 = vmul.f32 %v2644_v41, %v232_v43  ;;  %v230_v45 = vsel %vm229_vm3, %v2642_v35, %v226_v42 }
 0x133   :  { %v241_v48 = vmul.f32 %v230_v45, %v3114_v11  ;;  %v286_v11 = vld [vmem:[%s3637_s4] sm:$0x7]  ;;  %s2994_s4 = smov 96  }
 0x134   :  { %v234_v46 = vmul.f32 0.5, %v233_v44  ;;  %v288_v59 = vperm.slane %v286_v11, 0  ;;  %v289_v60 = vperm.slane %v286_v11, 1  ;;  %v290_v3 = vperm.slane %v286_v11, 2 }
 0x135   :  { %v246_v53 = vmul.f32 %v2633_v49, %v241_v48 }
 0x136   :  { %v235_v47 = vsub.f32 1.5, %v234_v46 }
 0x137   :  { %v251_v56 = vadd.f32 %v2634_v54, %v246_v53 }
 0x138   :  { %v236_v50 = vmul.f32 %v2644_v41, %v235_v47 }
 0x13a   :  { %v240_v51 = vsel %vm239_vm6, %v2644_v41, %v236_v50 }
 0x13b   :  { %v242_v52 = vmul.f32 %v240_v51, %v3120_v15 }
 0x13d   :  { %v247_v55 = vmul.f32 %v2633_v49, %v242_v52 }
 0x13f   :  { %v252_v57 = vadd.f32 %v2634_v54, %v247_v55 }
 0x141   :  { %v253_v58 = vpack.c.bf16 %v252_v57, %v251_v56 }
 0x143   :  { %430 = vmatmul.bf16.vlgmr.msra.gmra.mxu0 %v253_v58  ;;  %444 = vmatmul.bf16.vlgmr.msra.gmra.mxu1 %v253_v58 }
 0x144   :  { %458 = vmatmul.bf16.vlgmr.msra.gmra.mxu2 %v253_v58 }
 0x1c0   :  { %v431_v61 = vpop.f32.mrf.mxu0  ;;  %v445_v62 = vpop.f32.mrf.mxu1 }
 0x1c1   :  { %v432_v63 = vadd.f32 %v431_v61, %v288_v59  ;;  %v446_v2 = vadd.f32 %v445_v62, %v289_v60 }
 0x1c3   :  { %500 = vrot.lane.b32.xlu2 %v446_v2, %s2986_s3  ;;  %472 = vrot.lane.b32.xlu0 %v432_v63, %s2986_s3  ;;  %v512_v15 = vpack.c.bf16 %v446_v2, %v446_v2  ;;  %v484_v18 = vpack.c.bf16 %v432_v63, %v432_v63 }
 0x1c5   :  { %v553_v4 = vsel %vm548_vm7, %v512_v15, 0 }
 0x1c6   :  { %562 = vmatpush.bf16.xpose.msra.mxu3 %v553_v4 }
 0x1c7   :  { %v459_v5 = vpop.f32.mrf.mxu2 }
 0x1c8   :  { %v3134_v6 = vadd.f32 %v459_v5, %v290_v3  ;;  %v433_v7 = vpop.f32.mrf.mxu0  ;;  %v447_v9 = vpop.f32.mrf.mxu1 }
 0x1c9   :  { %v434_v10 = vadd.f32 %v433_v7, %v288_v59  ;;  %v448_v12 = vadd.f32 %v447_v9, %v289_v60 }
 0x1ca   :  { %v540_v13 = vpack.c.bf16 %v3134_v6, %v3134_v6 }
 0x1cb   :  { %494 = vrot.lane.b32.xlu2 %v446_v2, %s2994_s4  ;;  %474 = vrot.lane.b32.xlu0 %v434_v10, %s2986_s3  ;;  %v2618_v14 = vpack.i.bf16 %v448_v12, %v432_v63  ;;  %v513_v16 = vpack.c.bf16 %v448_v12, %v448_v12  ;;  %v485_v20 = vpack.c.bf16 %v434_v10, %v434_v10 }
 0x1cc   :  { %v803_v17 = vsel %vm801_vm8, %v540_v13, 0 }
 0x1cd   :  { %812 = vmatpush.bf16.msrb.mxu1 %v803_v17  ;;  %2619 = vrot.lane.b32.xlu1 %v2618_v14, %s2994_s4  ;;  %v572_v19 = vsel %vm548_vm7, %v513_v16, 0 }
 0x1ce   :  { %2188 = vmatmul.msk.bf16.vlgmr.msra.gmra.mxu3 %vm548_vm7, %v484_v18 }
 0x1cf   :  { %581 = vmatpush.bf16.xpose.msrb.mxu3 %v572_v19  ;;  %v461_v28 = vpop.f32.mrf.mxu2 }
 0x1d0   :  { %v3154_v31 = vadd.f32 %v461_v28, %v290_v3 }
 0x1d2   :  { %v541_v34 = vpack.c.bf16 %v3154_v31, %v3154_v31 }
 0x1d3   :  { %506 = vrot.lane.b32.xlu2 %v446_v2, %s2995_s21  ;;  %480 = vrot.lane.b32.xlu0 %v434_v10, %s2995_s21 }
 0x1d4   :  { %v822_v38 = vsel %vm801_vm8, %v541_v34, 0 }
 0x1d5   :  { %508 = vrot.lane.b32.xlu1 %v448_v12, %s2995_s21 }
 0x1db   :  { %502 = vrot.lane.b32.xlu2 %v448_v12, %s2986_s3 }
 0x1de   :  { %2189 = vmatmul.msk.bf16.vlgmr.msrb.gmra.mxu3 %vm548_vm7, %v485_v20 }
 0x1e3   :  { %468 = vrot.lane.b32.xlu2 %v434_v10, %s2994_s4 }
 0x1eb   :  { %478 = vrot.lane.b32.xlu2 %v432_v63, %s2995_s21 }
 0x21d   :  { %v501_v21 = vpop.permute.xlu2 %500 }
 0x21e   :  { %v516_v22 = vpack.c.bf16 %v501_v21, %v501_v21 }
 0x220   :  { %v629_v23 = vsel %vm548_vm7, %v516_v22, 0 }
 0x221   :  { %638 = vmatpush.bf16.xpose.msrb.mxu2 %v629_v23 }
 0x225   :  { %v495_v24 = vpop.permute.xlu2 %494 }
 0x226   :  { %v514_v25 = vpack.c.bf16 %v495_v24, %v495_v24 }
 0x228   :  { %v591_v26 = vsel %vm548_vm7, %v514_v25, 0  ;;  %v2623_v25 = vpack.i.bf16 %v3154_v31, %v3134_v6 }
 0x229   :  { %600 = vmatpush.bf16.xpose.msra.mxu3 %v591_v26 }
 0x22d   :  { %v507_v27 = vpop.permute.xlu2 %506 }
 0x22e   :  { %v518_v29 = vpack.c.bf16 %v507_v27, %v507_v27 }
 0x230   :  { %v667_v30 = vsel %vm548_vm7, %v518_v29, 0 }
 0x231   :  { %676 = vmatpush.bf16.xpose.msrb.mxu3 %v667_v30 }
 0x235   :  { %v503_v32 = vpop.permute.xlu2 %502  ;;  %v473_v33 = vpop.permute.xlu0 %472 }
 0x236   :  { %v517_v35 = vpack.c.bf16 %v503_v32, %v503_v32  ;;  %v488_v36 = vpack.c.bf16 %v473_v33, %v473_v33 }
 0x238   :  { %v648_v37 = vsel %vm548_vm7, %v517_v35, 0  ;;  %2192 = vmatmul.msk.bf16.vlgmr.msrb.gmra.mxu2 %vm548_vm7, %v488_v36 }
 0x239   :  { %657 = vmatpush.bf16.xpose.msra.mxu2 %v648_v37 }
 0x23d   :  { %v475_v44 = vpop.permute.xlu0 %474  ;;  %v469_v46 = vpop.permute.xlu2 %468 }
 0x23e   :  { %v489_v47 = vpack.c.bf16 %v475_v44, %v475_v44  ;;  %v487_v50 = vpack.c.bf16 %v469_v46, %v469_v46 }
 0x23f   :  { %v2620_v39 = vpop.permute.xlu1 %2619 }
 0x240   :  { %v2622_v40 = vunpack.i.h.bf16 %v2620_v39  ;;  %v2621_v41 = vunpack.i.l.bf16 %v2620_v39 }
 0x241   :  { %831 = vmatpush.bf16.msrb.mxu2 %v822_v38 }
 0x242   :  { %v515_v42 = vpack.c.bf16 %v2622_v40, %v2622_v40  ;;  %v486_v43 = vpack.c.bf16 %v2621_v41, %v2621_v41 }
 0x244   :  { %2190 = vmatmul.msk.bf16.vlgmr.msra.gmra.mxu3 %vm548_vm7, %v486_v43  ;;  %v610_v45 = vsel %vm548_vm7, %v515_v42, 0 }
 0x245   :  { %619 = vmatpush.bf16.xpose.msrb.mxu0 %v610_v45  ;;  %v479_v52 = vpop.permute.xlu2 %478  ;;  %v481_v56 = vpop.permute.xlu0 %480 }
 0x246   :  { %v490_v54 = vpack.c.bf16 %v479_v52, %v479_v52  ;;  %v491_v58 = vpack.c.bf16 %v481_v56, %v481_v56 }
 0x247   :  { %v509_v48 = vpop.permute.xlu1 %508 }
 0x248   :  { %v519_v49 = vpack.c.bf16 %v509_v48, %v509_v48  ;;  %2193 = vmatmul.msk.bf16.vlgmr.msra.gmra.mxu2 %vm548_vm7, %v489_v47 }
 0x24a   :  { %v686_v51 = vsel %vm548_vm7, %v519_v49, 0 }
 0x24c   :  { %2191 = vmatmul.msk.bf16.vlgmr.msrb.gmra.mxu0 %vm548_vm7, %v487_v50 }
 0x24d   :  { %695 = vmatpush.bf16.xpose.msra.mxu0 %v686_v51 }
 0x251   :  { %v564_v53 = vpop.f32.mrf.mxu3 }
 0x252   :  { %v702_v55 = vsel %vm701_vm9, %v564_v53, -inf }
 0x253   :  { %703 = vmax.xlane.f32.xlu0 %v702_v55 }
 0x254   :  { %2194 = vmatmul.msk.bf16.vlgmr.msrb.gmra.mxu3 %vm548_vm7, %v490_v54 }
 0x259   :  { %v566_v57 = vpop.f32.mrf.mxu3 }
 0x25c   :  { %2195 = vmatmul.msk.bf16.vlgmr.msra.gmra.mxu0 %vm548_vm7, %v491_v58 }
 0x261   :  { %v583_v11 = vpop.f32.mrf.mxu3 }
 0x262   :  { %v705_v59 = vsel %vm701_vm9, %v583_v11, -inf }
 0x263   :  { %706 = vmax.xlane.f32.xlu2 %v705_v59 }
 0x269   :  { %v585_v60 = vpop.f32.mrf.mxu3 }
 0x2bb   :  { %v640_v61 = vpop.f32.mrf.mxu2 }
 0x2bc   :  { %v714_v13 = vsel %vm701_vm9, %v640_v61, -inf }
 0x2c3   :  { %v642_v62 = vpop.f32.mrf.mxu2 }
 0x2c6   :  { %v704_v5 = vpop.xlane.xlu0 %703 }
 0x2c7   :  { %v602_v63 = vpop.f32.mrf.mxu3  ;;  %v726_v10 = vsub.f32 %v564_v53, %v704_v5 }
 0x2c8   :  { %v708_v2 = vsel %vm701_vm9, %v602_v63, -inf }
 0x2c9   :  { %v621_v15 = vpop.f32.mrf.mxu0  ;;  %709 = vmax.xlane.f32.xlu1 %v708_v2  ;;  %v734_v16 = vmul.f32 1.442695, %v726_v10 }
 0x2ca   :  { %v711_v3 = vsel %vm701_vm9, %v621_v15, -inf }
 0x2cb   :  { %v659_v4 = vpop.f32.mrf.mxu2  ;;  %712 = vmax.xlane.f32.xlu2 %v711_v3  ;;  %2645 = vpow2.f32 %v734_v16 }
 0x2cc   :  { %v717_v9 = vsel %vm701_vm9, %v659_v4, -inf }
 0x2cf   :  { %v604_v7 = vpop.f32.mrf.mxu3 }
 0x2d1   :  { %v623_v12 = vpop.f32.mrf.mxu0  ;;  %718 = vmax.xlane.f32.xlu1 %v717_v9  ;;  %v2646_v21 = vpop.eup %2645 }
 0x2d2   :  { %v750_v24 = vsel %vm701_vm9, %v2646_v21, 0.0  ;;  %v2628_v12 = vpack.i.bf16 %v3134_v6, %v3154_v31 }
 0x2d3   :  { %v661_v14 = vpop.f32.mrf.mxu2  ;;  %715 = vmax.xlane.f32.xlu2 %v714_v13 }
 0x2d6   :  { %v707_v26 = vpop.xlane.xlu2 %706 }
 0x2d7   :  { %v678_v17 = vpop.f32.mrf.mxu3  ;;  %v727_v27 = vsub.f32 %v583_v11, %v707_v26 }
 0x2d8   :  { %v720_v18 = vsel %vm701_vm9, %v678_v17, -inf }
 0x2d9   :  { %v697_v19 = vpop.f32.mrf.mxu0  ;;  %721 = vmax.xlane.f32.xlu0 %v720_v18  ;;  %v736_v28 = vmul.f32 1.442695, %v727_v27 }
 0x2da   :  { %v723_v20 = vsel %vm701_vm9, %v697_v19, -inf }
 0x2db   :  { %724 = vmax.xlane.f32.xlu1 %v723_v20  ;;  %2647 = vpow2.f32 %v736_v28 }
 0x2df   :  { %v680_v22 = vpop.f32.mrf.mxu3 }
 0x2e1   :  { %v699_v23 = vpop.f32.mrf.mxu0  ;;  %v3180_v29 = vpop.eup %2647 }
 0x2e2   :  { %v753_v30 = vsel %vm701_vm9, %v3180_v29, 0.0 }
 0x2e3   :  { %751 = vadd.xlane.f32.xlu1 %v750_v24 }
 0x2ed   :  { %2624 = vrot.lane.b32.xlu0 %v2623_v25, %s2994_s4 }
 0x317   :  { %754 = vadd.xlane.f32.xlu0 %v753_v30 }
 0x32b   :  { %534 = vrot.lane.b32.xlu0 %v3134_v6, %s2995_s21 }
 0x333   :  { %536 = vrot.lane.b32.xlu0 %v3154_v31, %s2995_s21 }
 0x33c   :  { %v710_v32 = vpop.xlane.xlu1 %709 }
 0x33d   :  { %v728_v33 = vsub.f32 %v602_v63, %v710_v32 }
 0x33e   :  { %v713_v34 = vpop.xlane.xlu2 %712 }
 0x33f   :  { %v738_v35 = vmul.f32 1.442695, %v728_v33  ;;  %v729_v36 = vsub.f32 %v621_v15, %v713_v34 }
 0x341   :  { %2649 = vpow2.f32 %v738_v35  ;;  %v740_v37 = vmul.f32 1.442695, %v729_v36 }
 0x343   :  { %2651 = vpow2.f32 %v740_v37 }
 0x344   :  { %v719_v38 = vpop.xlane.xlu1 %718 }
 0x345   :  { %v731_v39 = vsub.f32 %v659_v4, %v719_v38 }
 0x346   :  { %v716_v40 = vpop.xlane.xlu2 %715 }
 0x347   :  { %v3188_v41 = vpop.eup %2649  ;;  %v744_v42 = vmul.f32 1.442695, %v731_v39  ;;  %v730_v43 = vsub.f32 %v640_v61, %v716_v40 }
 0x348   :  { %v756_v44 = vsel %vm701_vm9, %v3188_v41, 0.0 }
 0x349   :  { %2653 = vpow2.f32 %v744_v42  ;;  %757 = vadd.xlane.f32.xlu2 %v756_v44  ;;  %v742_v45 = vmul.f32 1.442695, %v730_v43  ;;  %v3192_v47 = vpop.eup %2651 }
 0x34a   :  { %v759_v51 = vsel %vm701_vm9, %v3192_v47, 0.0 }
 0x34b   :  { %2655 = vpow2.f32 %v742_v45 }
 0x34c   :  { %v722_v46 = vpop.xlane.xlu0 %721 }
 0x34d   :  { %v732_v48 = vsub.f32 %v678_v17, %v722_v46 }
 0x34e   :  { %v725_v49 = vpop.xlane.xlu1 %724 }
 0x34f   :  { %v3194_v50 = vpop.eup %2653  ;;  %v746_v53 = vmul.f32 1.442695, %v732_v48  ;;  %v733_v56 = vsub.f32 %v697_v19, %v725_v49 }
 0x350   :  { %v765_v52 = vsel %vm701_vm9, %v3194_v50, 0.0 }
 0x351   :  { %760 = vadd.xlane.f32.xlu2 %v759_v51  ;;  %766 = vadd.xlane.f32.xlu1 %v765_v52  ;;  %v3200_v54 = vpop.eup %2655  ;;  %2657 = vpow2.f32 %v746_v53  ;;  %v748_v58 = vmul.f32 1.442695, %v733_v56 }
 0x352   :  { %v762_v57 = vsel %vm701_vm9, %v3200_v54, 0.0 }
 0x356   :  { %v752_v55 = vpop.xlane.xlu1 %751 }
 0x357   :  { %2659 = vrcp.f32 %v752_v55  ;;  %v2658_v11 = vpop.eup %2657 }
 0x358   :  { %2661 = vpow2.f32 %v748_v58  ;;  %v768_v2 = vsel %vm701_vm9, %v2658_v11, 0.0 }
 0x359   :  { %763 = vadd.xlane.f32.xlu2 %v762_v57 }
 0x35d   :  { %v2660_v59 = vpop.eup %2659 }
 0x35e   :  { %v782_v60 = vmul.f32 %v2660_v59, %v2646_v21  ;;  %v2662_v9 = vpop.eup %2661 }
 0x35f   :  { %v2625_v61 = vpop.permute.xlu0 %2624  ;;  %v771_v10 = vsel %vm701_vm9, %v2662_v9, 0.0 }
 0x360   :  { %v2627_v62 = vunpack.i.h.bf16 %v2625_v61  ;;  %v2626_v63 = vunpack.i.l.bf16 %v2625_v61  ;;  %v790_v15 = vpack.c.bf16 %v782_v60, %v782_v60 }
 0x361   :  { %769 = vadd.xlane.f32.xlu2 %v768_v2 }
 0x362   :  { %v543_v3 = vpack.c.bf16 %v2627_v62, %v2627_v62  ;;  %v542_v4 = vpack.c.bf16 %v2626_v63, %v2626_v63  ;;  %2196 = vmatmul.msk.bf16.vlgmr.msrb.gmra.mxu1 %vm701_vm9, %v790_v15 }
 0x364   :  { %v841_v5 = vsel %vm801_vm8, %v542_v4, 0  ;;  %v860_v7 = vsel %vm801_vm8, %v543_v3, 0 }
 0x365   :  { %850 = vmatpush.bf16.msra.mxu3 %v841_v5  ;;  %869 = vmatpush.bf16.msrb.mxu0 %v860_v7 }
 0x369   :  { %772 = vadd.xlane.f32.xlu2 %v771_v10 }
 0x36a   :  { %2629 = vrot.lane.b32.xlu1 %v2628_v12, %s2986_s3 }
 0x38a   :  { %v755_v13 = vpop.xlane.xlu0 %754 }
 0x38b   :  { %2663 = vrcp.f32 %v755_v13 }
 0x391   :  { %v2664_v14 = vpop.eup %2663 }
 0x392   :  { %v783_v16 = vmul.f32 %v2664_v14, %v3180_v29 }
 0x394   :  { %v791_v17 = vpack.c.bf16 %v783_v16, %v783_v16 }
 0x396   :  { %2197 = vmatmul.msk.bf16.vlgmr.msrb.gmra.mxu2 %vm701_vm9, %v791_v17 }
 0x39d   :  { %v535_v18 = vpop.permute.xlu0 %534 }
 0x39e   :  { %v546_v19 = vpack.c.bf16 %v535_v18, %v535_v18 }
 0x3a0   :  { %v917_v20 = vsel %vm801_vm8, %v546_v19, 0 }
 0x3a1   :  { %926 = vmatpush.bf16.msrb.mxu3 %v917_v20 }
 0x3a5   :  { %v537_v21 = vpop.permute.xlu0 %536 }
 0x3a6   :  { %v547_v22 = vpack.c.bf16 %v537_v21, %v537_v21 }
 0x3a8   :  { %v936_v6 = vsel %vm801_vm8, %v547_v22, 0 }
 0x3a9   :  { %945 = vmatpush.bf16.msra.mxu0 %v936_v6 }
 0x3bc   :  { %v758_v31 = vpop.xlane.xlu2 %757 }
 0x3bd   :  { %2665 = vrcp.f32 %v758_v31 }
 0x3c3   :  { %v2666_v23 = vpop.eup %2665 }
 0x3c4   :  { %v784_v24 = vmul.f32 %v2666_v23, %v3188_v41  ;;  %v761_v25 = vpop.xlane.xlu2 %760  ;;  %v767_v32 = vpop.xlane.xlu1 %766 }
 0x3c5   :  { %2667 = vrcp.f32 %v761_v25 }
 0x3c6   :  { %v792_v26 = vpack.c.bf16 %v784_v24, %v784_v24  ;;  %2669 = vrcp.f32 %v767_v32  ;;  %v2528_v32 = vld [vmem:[#allocation10 + $0x20] sm:$0xff] }
 0x3c8   :  { %2198 = vmatmul.msk.bf16.vlgmr.msra.gmra.mxu3 %vm701_vm9, %v792_v26 }
 0x3cb   :  { %v2668_v27 = vpop.eup %2667 }
 0x3cc   :  { %v785_v28 = vmul.f32 %v2668_v27, %v3192_v47  ;;  %v764_v29 = vpop.xlane.xlu2 %763  ;;  %v2670_v34 = vpop.eup %2669 }
 0x3cd   :  { %v787_v43 = vmul.f32 %v2670_v34, %v3194_v50  ;;  %v2526_v34 = vld [vmem:[#allocation10 + $0x10] sm:$0xff] }
 0x3ce   :  { %v793_v30 = vpack.c.bf16 %v785_v28, %v785_v28  ;;  %v2531_v28 = vld [vmem:[#allocation10 + $0x38] sm:$0xff] }
 0x3cf   :  { %v795_v52 = vpack.c.bf16 %v787_v43, %v787_v43  ;;  %v2635_v43 = vld [vmem:[#allocation11] ss:$0 sm:$0xff] }
 0x3d0   :  { %2199 = vmatmul.msk.bf16.vlgmr.msrb.gmra.mxu0 %vm701_vm9, %v793_v30  ;;  %v2529_v30 = vld [vmem:[#allocation10 + $0x28] sm:$0xff] }
 0x3d4   :  { %v770_v33 = vpop.xlane.xlu2 %769 }
 0x3d5   :  { %2671 = vrcp.f32 %v770_v33  ;;  %v2527_v33 = vld [vmem:[#allocation10 + $0x18] sm:$0xff] }
 0x3d6   :  { %2673 = vrcp.f32 %v764_v29  ;;  %v2530_v29 = vld [vmem:[#allocation10 + $0x30] sm:$0xff] }
 0x3db   :  { %v2672_v35 = vpop.eup %2671 }
 0x3dc   :  { %v2674_v36 = vpop.eup %2673  ;;  %v788_v37 = vmul.f32 %v2672_v35, %v2658_v11  ;;  %v2630_v38 = vpop.permute.xlu1 %2629  ;;  %v2525_v35 = vld [vmem:[#allocation10 + $0x8] sm:$0xff] }
 0x3dd   :  { %v773_v39 = vpop.xlane.xlu2 %772  ;;  %v2632_v40 = vunpack.i.h.bf16 %v2630_v38  ;;  %v2631_v41 = vunpack.i.l.bf16 %v2630_v38  ;;  %v786_v44 = vmul.f32 %v2674_v36, %v3200_v54  ;;  %v2524_v36 = vld [vmem:[#allocation10] sm:$0xff] }
 0x3de   :  { %2675 = vrcp.f32 %v773_v39  ;;  %v796_v42 = vpack.c.bf16 %v788_v37, %v788_v37 }
 0x3df   :  { %v544_v45 = vpack.c.bf16 %v2632_v40, %v2632_v40  ;;  %v545_v46 = vpack.c.bf16 %v2631_v41, %v2631_v41  ;;  %v814_v47 = vpop.f32.mrf.mxu1  ;;  %v794_v53 = vpack.c.bf16 %v786_v44, %v786_v44 }
 0x3e0   :  { %2202 = vmatmul.msk.bf16.vlgmr.msrb.gmra.mxu3 %vm701_vm9, %v796_v42  ;;  %v951_v56 = vpack.c.bf16 %v814_v47, %v814_v47 }
 0x3e1   :  { %v879_v48 = vsel %vm801_vm8, %v544_v45, 0  ;;  %v898_v49 = vsel %vm801_vm8, %v545_v46, 0 }
 0x3e2   :  { %888 = vmatpush.bf16.msra.mxu1 %v879_v48  ;;  %907 = vmatpush.bf16.msra.mxu2 %v898_v49  ;;  %v961_v11 = vunpack.c.l.b16 %v951_v56  ;;  %v2350_v56 = vld [vmem:[#allocation16 + $0xe0] sm:$0xf] }
 0x3e4   :  { %v2676_v51 = vpop.eup %2675 }
 0x3e5   :  { %v789_v55 = vmul.f32 %v2676_v51, %v2662_v9  ;;  %2200 = vmatmul.msk.bf16.vlgmr.msra.gmra.mxu1 %vm701_vm9, %v794_v53  ;;  %2201 = vmatmul.msk.bf16.vlgmr.msra.gmra.mxu2 %vm701_vm9, %v795_v52 }
 0x3e6   :  { %1059 = vmatpush.bf16.msrb.mxu1 %v2531_v28  ;;  %v2328_v28 = vld [vmem:[#allocation16 + $0xb8] sm:$0xf0] }
 0x3e7   :  { %v797_v50 = vpack.c.bf16 %v789_v55, %v789_v55  ;;  %v816_v54 = vpop.f32.mrf.mxu1 }
 0x3e9   :  { %2203 = vmatmul.msk.bf16.vlgmr.msra.gmra.mxu0 %vm701_vm9, %v797_v50 }
 0x3ea   :  { %1060 = vmatpush.bf16.msrb.mxu1 %v2530_v29 }
 0x3ee   :  { %1061 = vmatpush.bf16.msrb.mxu1 %v2529_v30  ;;  %v2302_v30 = vld [vmem:[#allocation16 + $0x80] sm:$0xf] }
 0x3f2   :  { %1062 = vmatpush.bf16.msrb.mxu1 %v2528_v32  ;;  %v2550_v32 = vld [vmem:[#allocation16 + $0x8c] sm:$0xf0] }
 0x3f6   :  { %1063 = vmatpush.bf16.msrb.mxu1 %v2527_v33  ;;  %v2548_v33 = vld [vmem:[#allocation16 + $0x84] sm:$0xf] }
 0x3fa   :  { %1064 = vmatpush.bf16.msrb.mxu1 %v2526_v34  ;;  %v2303_v34 = vor.u32 %v2550_v32, %v2302_v30 }
 0x3fe   :  { %1065 = vmatpush.bf16.msrb.mxu1 %v2525_v35  ;;  %v2304_v35 = vld [vmem:[#allocation16 + $0x90] sm:$0xf0] }
 0x402   :  { %1066 = vmatpush.bf16.msrb.mxu1 %v2524_v36  ;;  %v2310_v36 = vld [vmem:[#allocation16 + $0x88] sm:$0xf] }
 0x419   :  { %v833_v57 = vpop.f32.mrf.mxu2 }
 0x41a   :  { %v952_v58 = vpack.c.bf16 %v833_v57, %v833_v57  ;;  %v2562_v57 = vld [vmem:[#allocation16 + $0xec] sm:$0xf0] }
 0x41c   :  { %v962_v59 = vunpack.c.l.b16 %v952_v58  ;;  %v2560_v58 = vld [vmem:[#allocation16 + $0xe4] sm:$0xf] }
 0x41e   :  { %v963_v60 = vpack.c.b16 %v962_v59, %v961_v11  ;;  %v2351_v11 = vor.u32 %v2562_v57, %v2350_v56  ;;  %v2352_v59 = vld [vmem:[#allocation16 + $0xf0] sm:$0xf0]  ;;  %v2270_v57 = vld [vmem:[#allocation16 + $0x40] sm:$0xf] }
 0x420   :  { %1336 = vmatpush.bf16.msrb.mxu2 %v2351_v11  ;;  %v2540_v11 = vld [vmem:[#allocation16 + $0x44] sm:$0xf] }
 0x421   :  { %v835_v61 = vpop.f32.mrf.mxu2 }
 0x422   :  { %v2563_v61 = vld [vmem:[#allocation16 + $0xf4] sm:$0xf0] }
 0x44b   :  { %v852_v62 = vpop.f32.mrf.mxu3 }
 0x44c   :  { %v953_v63 = vpack.c.bf16 %v852_v62, %v852_v62  ;;  %v2355_v62 = vor.u32 %v2560_v58, %v2352_v59  ;;  %v2542_v58 = vld [vmem:[#allocation16 + $0x4c] sm:$0xf0] }
 0x44d   :  { %v871_v2 = vpop.f32.mrf.mxu0  ;;  %v2271_v59 = vor.u32 %v2542_v58, %v2270_v57  ;;  %v2637_v57 = vld [vmem:[#allocation14] ss:$0 sm:$0xff] }
 0x44e   :  { %v954_v15 = vpack.c.bf16 %v871_v2, %v871_v2  ;;  %v966_v3 = vunpack.c.l.b16 %v953_v63  ;;  %v2561_v2 = vld [vmem:[#allocation16 + $0xec] sm:$0xf]  ;;  %1350 = vmatpush.bf16.msra.mxu3 %v2355_v62  ;;  %v2543_v62 = vld [vmem:[#allocation16 + $0x54] sm:$0xf0] }
 0x450   :  { %v967_v4 = vunpack.c.l.b16 %v954_v15  ;;  %v2360_v15 = vld [vmem:[#allocation16 + $0xf8] sm:$0xf0] }
 0x452   :  { %v968_v5 = vpack.c.b16 %v967_v4, %v966_v3  ;;  %v2363_v3 = vor.u32 %v2561_v2, %v2360_v15  ;;  %v2334_v4 = vld [vmem:[#allocation16 + $0xc0] sm:$0xf]  ;;  %v2541_v15 = vld [vmem:[#allocation16 + $0x4c] sm:$0xf] }
 0x453   :  { %v854_v7 = vpop.f32.mrf.mxu3 }
 0x454   :  { %969 = vrot.lane.b32.xlu2 %v968_v5, %s2995_s21  ;;  %v2558_v5 = vld [vmem:[#allocation16 + $0xcc] sm:$0xf0]  ;;  %v2556_v7 = vld [vmem:[#allocation16 + $0xc4] sm:$0xf]  ;;  %1378 = vmatpush.bf16.msra.mxu1 %v2363_v3  ;;  %v2280_v3 = vld [vmem:[#allocation16 + $0x58] sm:$0xf0] }
 0x455   :  { %v873_v9 = vpop.f32.mrf.mxu0 }
 0x456   :  { %v2335_v9 = vor.u32 %v2558_v5, %v2334_v4  ;;  %v2283_v4 = vor.u32 %v2541_v15, %v2280_v3  ;;  %v2254_v5 = vld [vmem:[#allocation16 + $0x20] sm:$0xf] }
 0x458   :  { %1337 = vmatpush.bf16.msrb.mxu2 %v2335_v9  ;;  %v2536_v9 = vld [vmem:[#allocation16 + $0x24] sm:$0xf] }
 0x462   :  { %v890_v10 = vpop.f32.mrf.mxu1 }
 0x463   :  { %v928_v12 = vpop.f32.mrf.mxu3  ;;  %v955_v17 = vpack.c.bf16 %v890_v10, %v890_v10  ;;  %v2336_v10 = vld [vmem:[#allocation16 + $0xd0] sm:$0xf0] }
 0x464   :  { %v957_v13 = vpack.c.bf16 %v928_v12, %v928_v12  ;;  %v2342_v12 = vld [vmem:[#allocation16 + $0xc8] sm:$0xf] }
 0x465   :  { %v973_v31 = vunpack.c.l.b16 %v955_v17  ;;  %v2557_v17 = vld [vmem:[#allocation16 + $0xcc] sm:$0xf] }
 0x466   :  { %v947_v14 = vpop.f32.mrf.mxu0  ;;  %v980_v18 = vunpack.c.l.b16 %v957_v13  ;;  %v2559_v13 = vld [vmem:[#allocation16 + $0xd4] sm:$0xf0] }
 0x467   :  { %v958_v16 = vpack.c.bf16 %v947_v14, %v947_v14  ;;  %v2339_v14 = vor.u32 %v2556_v7, %v2336_v10  ;;  %v2538_v7 = vld [vmem:[#allocation16 + $0x2c] sm:$0xf0] }
 0x468   :  { %v909_v20 = vpop.f32.mrf.mxu2  ;;  %v2255_v10 = vor.u32 %v2538_v7, %v2254_v5 }
 0x469   :  { %v981_v19 = vunpack.c.l.b16 %v958_v16  ;;  %v956_v21 = vpack.c.bf16 %v909_v20, %v909_v20  ;;  %v2343_v16 = vor.u32 %v2559_v13, %v2342_v12  ;;  %1351 = vmatpush.bf16.msra.mxu3 %v2339_v14  ;;  %v2318_v20 = vld [vmem:[#allocation16 + $0xa0] sm:$0xf]  ;;  %v2256_v12 = vld [vmem:[#allocation16 + $0x30] sm:$0xf0]  ;;  %v2262_v13 = vld [vmem:[#allocation16 + $0x28] sm:$0xf] }
 0x46a   :  { %v892_v6 = vpop.f32.mrf.mxu1  ;;  %v2539_v14 = vld [vmem:[#allocation16 + $0x34] sm:$0xf0] }
 0x46b   :  { %v982_v22 = vpack.c.b16 %v981_v19, %v980_v18  ;;  %v974_v23 = vunpack.c.l.b16 %v956_v21  ;;  %v930_v24 = vpop.f32.mrf.mxu3  ;;  %v2344_v18 = vld [vmem:[#allocation16 + $0xd8] sm:$0xf0]  ;;  %v2554_v21 = vld [vmem:[#allocation16 + $0xac] sm:$0xf0] }
 0x46c   :  { %v2347_v19 = vor.u32 %v2557_v17, %v2344_v18  ;;  %v2319_v6 = vor.u32 %v2554_v21, %v2318_v20  ;;  %v2555_v24 = vld [vmem:[#allocation16 + $0xb4] sm:$0xf0]  ;;  %v2259_v17 = vor.u32 %v2536_v9, %v2256_v12  ;;  %v2263_v18 = vor.u32 %v2539_v14, %v2262_v13  ;;  %v2264_v20 = vld [vmem:[#allocation16 + $0x38] sm:$0xf0]  ;;  %v2238_v21 = vld [vmem:[#allocation16] sm:$0xf] }
 0x46d   :  { %983 = vrot.lane.b32.xlu1 %v982_v22, %s2994_s4  ;;  %v975_v26 = vpack.c.b16 %v974_v23, %v973_v31  ;;  %v2552_v22 = vld [vmem:[#allocation16 + $0xa4] sm:$0xf]  ;;  %v2320_v31 = vld [vmem:[#allocation16 + $0xb0] sm:$0xf0]  ;;  %v2326_v23 = vld [vmem:[#allocation16 + $0xa8] sm:$0xf] }
 0x46e   :  { %v949_v25 = vpop.f32.mrf.mxu0  ;;  %1379 = vmatpush.bf16.msra.mxu1 %v2347_v19  ;;  %1338 = vmatpush.bf16.msrb.mxu2 %v2319_v6  ;;  %v2537_v19 = vld [vmem:[#allocation16 + $0x2c] sm:$0xf] }
 0x46f   :  { %976 = vrot.lane.b32.xlu0 %v975_v26, %s2986_s3  ;;  %v2323_v25 = vor.u32 %v2552_v22, %v2320_v31  ;;  %v2327_v26 = vor.u32 %v2555_v24, %v2326_v23  ;;  %v2267_v6 = vor.u32 %v2537_v19, %v2264_v20  ;;  %v2534_v31 = vld [vmem:[#allocation16 + $0xc] sm:$0xf0]  ;;  %v2532_v23 = vld [vmem:[#allocation16 + $0x4] sm:$0xf]  ;;  %v2240_v24 = vld [vmem:[#allocation16 + $0x10] sm:$0xf0] }
 0x470   :  { %v911_v27 = vpop.f32.mrf.mxu2  ;;  %s2074_s3 = sshll.u32 %s3646_s13, 4  ;;  %s2075_s3 = int_to_ptr.hbm [resolvable:$true] %s2074_s3 }
 0x471   :  { %v2553_v27 = vld [vmem:[#allocation16 + $0xac] sm:$0xf]  ;;  %1352 = vmatpush.bf16.msra.mxu3 %v2323_v25  ;;  %v2239_v25 = vor.u32 %v2534_v31, %v2238_v21 }
 0x472   :  { %v2331_v29 = vor.u32 %v2553_v27, %v2328_v28  ;;  %1339 = vmatpush.bf16.msrb.mxu2 %v2303_v34  ;;  %v2246_v27 = vld [vmem:[#allocation16 + $0x8] sm:$0xf]  ;;  %v2535_v28 = vld [vmem:[#allocation16 + $0x14] sm:$0xf0] }
 0x473   :  { %v2247_v32 = vor.u32 %v2535_v28, %v2246_v27 }
 0x474   :  { %1380 = vmatpush.bf16.msra.mxu1 %v2331_v29  ;;  %v2533_v29 = vld [vmem:[#allocation16 + $0xc] sm:$0xf] }
 0x4ae   :  { %v970_v37 = vpop.permute.xlu2 %969 }
 0x4af   :  { %v987_v38 = vsel %vm548_vm7, %v963_v60, %v970_v37  ;;  %v2358_v60 = vld [vmem:[#allocation16 + $0xe8] sm:$0xf]  ;;  %v2551_v37 = vld [vmem:[#allocation16 + $0x94] sm:$0xf0] }
 0x4b0   :  { %v2359_v63 = vor.u32 %v2563_v61, %v2358_v60  ;;  %v2272_v60 = vld [vmem:[#allocation16 + $0x50] sm:$0xf0]  ;;  %v2278_v61 = vld [vmem:[#allocation16 + $0x48] sm:$0xf] }
 0x4b1   :  { %v2279_v2 = vor.u32 %v2543_v62, %v2278_v61 }
 0x4b2   :  { %1364 = vmatpush.bf16.msrb.mxu0 %v2359_v63  ;;  %v2275_v63 = vor.u32 %v2540_v11, %v2272_v60 }
 0x4b6   :  { %1365 = vmatpush.bf16.msrb.mxu0 %v2343_v16 }
 0x4ba   :  { %1366 = vmatpush.bf16.msrb.mxu0 %v2327_v26  ;;  %v2243_v26 = vor.u32 %v2532_v23, %v2240_v24 }
 0x4df   :  { %v984_v40 = vpop.permute.xlu1 %983 }
 0x4e1   :  { %v977_v39 = vpop.permute.xlu0 %976 }
 0x4e2   :  { %v990_v41 = vsel %vm988_vm10, %v987_v38, %v977_v39  ;;  %v2307_v38 = vor.u32 %v2548_v33, %v2304_v35  ;;  %v2311_v39 = vor.u32 %v2551_v37, %v2310_v36  ;;  %v2248_v33 = vld [vmem:[#allocation16 + $0x18] sm:$0xf0] }
 0x4e3   :  { %v993_v42 = vsel %vm991_vm11, %v990_v41, %v984_v40  ;;  %v2549_v40 = vld [vmem:[#allocation16 + $0x8c] sm:$0xf]  ;;  %v2312_v41 = vld [vmem:[#allocation16 + $0x98] sm:$0xf0]  ;;  %v2251_v34 = vor.u32 %v2533_v29, %v2248_v33 }
 0x4e4   :  { %1067 = vmatmul.bf16.vlgmr.msrb.gmra.mxu1 %v993_v42  ;;  %v2315_v42 = vor.u32 %v2549_v40, %v2312_v41  ;;  %1353 = vmatpush.bf16.msra.mxu3 %v2307_v38 }
 0x4e5   :  { %1367 = vmatpush.bf16.msrb.mxu0 %v2311_v39 }
 0x4e6   :  { %1381 = vmatpush.bf16.msra.mxu1 %v2315_v42 }
 0x561   :  { %v1068_v44 = vpop.f32.mrf.mxu1 }
 0x562   :  { %v1073_v45 = vadd.f32 %v1068_v44, %v3104_v0  ;;  %v2546_v44 = vld [vmem:[#allocation16 + $0x6c] sm:$0xf0] }
 0x564   :  { %v3233_v46 = vadd.f32 %v2635_v43, %v1073_v45  ;;  %v2544_v45 = vld [vmem:[#allocation16 + $0x64] sm:$0xf] }
 0x566   :  { %1083 = vadd.xlane.f32.xlu0 %v3233_v46 }
 0x569   :  { %v1070_v47 = vpop.f32.mrf.mxu1 }
 0x56a   :  { %v1074_v48 = vadd.f32 %v1070_v47, %v3107_v1 }
 0x56c   :  { %v3237_v49 = vadd.f32 %v2635_v43, %v1074_v48  ;;  %v2286_v43 = vld [vmem:[#allocation16 + $0x60] sm:$0xf]  ;;  %v2288_v48 = vld [vmem:[#allocation16 + $0x70] sm:$0xf0] }
 0x56d   :  { %v2287_v47 = vor.u32 %v2546_v44, %v2286_v43 }
 0x56e   :  { %1085 = vadd.xlane.f32.xlu1 %v3237_v49 }
 0x56f   :  { %1340 = vmatpush.bf16.msrb.mxu2 %v2287_v47 }
 0x573   :  { %1341 = vmatpush.bf16.msrb.mxu2 %v2271_v59 }
 0x577   :  { %1342 = vmatpush.bf16.msrb.mxu2 %v2255_v10 }
 0x57b   :  { %1343 = vmatpush.bf16.msrb.mxu2 %v2239_v25 }
 0x5d9   :  { %v1084_v51 = vpop.xlane.xlu0 %1083 }
 0x5da   :  { %v1087_v52 = vmul.f32 %v1084_v51, %v3110_v8  ;;  %v2294_v51 = vld [vmem:[#allocation16 + $0x68] sm:$0xf] }
 0x5dc   :  { %v3242_v53 = vsub.f32 %v3233_v46, %v1087_v52  ;;  %v2547_v52 = vld [vmem:[#allocation16 + $0x74] sm:$0xf0] }
 0x5de   :  { %v1091_v0 = vmul.f32 %v3242_v53, %v3242_v53 }
 0x5e0   :  { %1093 = vadd.xlane.f32.xlu2 %v1091_v0  ;;  %v2291_v0 = vor.u32 %v2544_v45, %v2288_v48 }
 0x5e1   :  { %v1086_v55 = vpop.xlane.xlu1 %1085 }
 0x5e2   :  { %v1088_v50 = vmul.f32 %v1086_v55, %v3110_v8  ;;  %v2295_v55 = vor.u32 %v2547_v52, %v2294_v51  ;;  %1354 = vmatpush.bf16.msra.mxu3 %v2291_v0  ;;  %v2636_v0 = vld [vmem:[#allocation13] ss:$0 sm:$0xff] }
 0x5e4   :  { %v3248_v54 = vsub.f32 %v3237_v49, %v1088_v50  ;;  %v2545_v50 = vld [vmem:[#allocation16 + $0x6c] sm:$0xf]  ;;  %1368 = vmatpush.bf16.msrb.mxu0 %v2295_v55 }
 0x5e6   :  { %v1092_v1 = vmul.f32 %v3248_v54, %v3248_v54  ;;  %1355 = vmatpush.bf16.msra.mxu3 %v2275_v63 }
 0x5e8   :  { %1095 = vadd.xlane.f32.xlu0 %v1092_v1  ;;  %v2296_v1 = vld [vmem:[#allocation16 + $0x78] sm:$0xf0]  ;;  %1369 = vmatpush.bf16.msrb.mxu0 %v2279_v2 }
 0x5e9   :  { %v2299_v56 = vor.u32 %v2545_v50, %v2296_v1 }
 0x5ea   :  { %1356 = vmatpush.bf16.msra.mxu3 %v2259_v17 }
 0x5eb   :  { %1382 = vmatpush.bf16.msra.mxu1 %v2299_v56 }
 0x5ec   :  { %1370 = vmatpush.bf16.msrb.mxu0 %v2263_v18 }
 0x5ee   :  { %1357 = vmatpush.bf16.msra.mxu3 %v2243_v26 }
 0x5ef   :  { %1383 = vmatpush.bf16.msra.mxu1 %v2283_v4 }
 0x5f0   :  { %1371 = vmatpush.bf16.msrb.mxu0 %v2247_v32 }
 0x5f3   :  { %1384 = vmatpush.bf16.msra.mxu1 %v2267_v6 }
 0x5f7   :  { %1385 = vmatpush.bf16.msra.mxu1 %v2251_v34 }
 0x653   :  { %v1094_v16 = vpop.xlane.xlu2 %1093 }
 0x654   :  { %v1097_v22 = vmul.f32 %v1094_v16, %v3110_v8 }
 0x656   :  { %v1099_v30 = vadd.f32 1e-05, %v1097_v22 }
 0x658   :  { %2677 = vrsqrt.f32 %v1099_v30  ;;  %vm1107_vm13 = vweird.f32 %v1099_v30 }
 0x65b   :  { %v1096_v35 = vpop.xlane.xlu0 %1095 }
 0x65c   :  { %v1098_v36 = vmul.f32 %v1096_v35, %v3110_v8 }
 0x65e   :  { %v2678_v37 = vpop.eup %2677  ;;  %v1100_v38 = vadd.f32 1e-05, %v1098_v36 }
 0x65f   :  { %v1102_v39 = vmul.f32 %v2678_v37, %v1099_v30  ;;  %vm1108_vm12 = vweird.f32 %v2678_v37 }
 0x660   :  { %2679 = vrsqrt.f32 %v1100_v38  ;;  %vm1109_vm14 = vmor %vm1107_vm13, %vm1108_vm12  ;;  %vm1117_vm0 = vweird.f32 %v1100_v38 }
 0x661   :  { %v1103_v40 = vmul.f32 %v2678_v37, %v1102_v39 }
 0x663   :  { %v1104_v41 = vmul.f32 0.5, %v1103_v40 }
 0x665   :  { %v1105_v42 = vsub.f32 1.5, %v1104_v41 }
 0x666   :  { %v2680_v43 = vpop.eup %2679 }
 0x667   :  { %v1106_v44 = vmul.f32 %v2678_v37, %v1105_v42  ;;  %v1112_v45 = vmul.f32 %v2680_v43, %v1100_v38  ;;  %vm1118_vm15 = vweird.f32 %v2680_v43 }
 0x668   :  { %vm1119_vm1 = vmor %vm1117_vm0, %vm1118_vm15 }
 0x669   :  { %v1113_v47 = vmul.f32 %v2680_v43, %v1112_v45  ;;  %v1110_v48 = vsel %vm1109_vm14, %v2678_v37, %v1106_v44 }
 0x66a   :  { %v1121_v8 = vmul.f32 %v1110_v48, %v3242_v53  ;;  %v3259_v53 = vld [vmem:[%s3643_s10] sm:$0xf] }
 0x66b   :  { %v1114_v51 = vmul.f32 0.5, %v1113_v47  ;;  %v1170_v61 = vperm.slane %v3259_v53, 2  ;;  %v1171_v62 = vperm.slane %v3259_v53, 3  ;;  %v1168_v3 = vperm.slane %v3259_v53, 0 }
 0x66c   :  { %v1126_v56 = vmul.f32 %v2636_v0, %v1121_v8  ;;  %v1169_v7 = vperm.slane %v3259_v53, 1 }
 0x66d   :  { %v1115_v52 = vsub.f32 1.5, %v1114_v51 }
 0x66e   :  { %v1131_v11 = vadd.f32 %v2637_v57, %v1126_v56 }
 0x66f   :  { %v1116_v55 = vmul.f32 %v2680_v43, %v1115_v52 }
 0x671   :  { %v1120_v50 = vsel %vm1119_vm1, %v2680_v43, %v1116_v55 }
 0x672   :  { %v1122_v1 = vmul.f32 %v1120_v50, %v3248_v54 }
 0x674   :  { %v1127_v58 = vmul.f32 %v2636_v0, %v1122_v1 }
 0x676   :  { %v1132_v59 = vadd.f32 %v2637_v57, %v1127_v58 }
 0x678   :  { %v1133_v60 = vpack.c.bf16 %v1132_v59, %v1131_v11 }
 0x67a   :  { %1344 = vmatmul.bf16.vlgmr.msrb.gmra.mxu2 %v1133_v60  ;;  %1358 = vmatmul.bf16.vlgmr.msra.gmra.mxu3 %v1133_v60 }
 0x67b   :  { %1372 = vmatmul.bf16.vlgmr.msrb.gmra.mxu0 %v1133_v60  ;;  %1386 = vmatmul.bf16.vlgmr.msra.gmra.mxu1 %v1133_v60 }
 0x6f8   :  { %v1373_v54 = vpop.f32.mrf.mxu0  ;;  %v1387_v63 = vpop.f32.mrf.mxu1 }
 0x6f9   :  { %v3263_v2 = vadd.f32 %v1373_v54, %v1170_v61  ;;  %v3267_v15 = vadd.f32 %v1387_v63, %v1171_v62 }
 0x6fb   :  { %v3271_v4 = vmul.f32 0.70710677, %v3263_v2  ;;  %v3274_v5 = vmul.f32 0.70710677, %v3267_v15 }
 0x6fd   :  { %v1488_v9 = vmul.f32 %v3271_v4, %v3271_v4  ;;  %v1528_v10 = vmul.f32 %v3274_v5, %v3274_v5  ;;  %v1345_v12 = vpop.f32.mrf.mxu2  ;;  %v1359_v13 = vpop.f32.mrf.mxu3 }
 0x6fe   :  { %v3283_v14 = vadd.f32 %v1345_v12, %v1168_v3  ;;  %v3291_v18 = vadd.f32 %v1359_v13, %v1169_v7 }
 0x6ff   :  { %v3285_v16 = vmin.f32 %v1488_v9, 16.0  ;;  %v3287_v17 = vmin.f32 %v1528_v10, 16.0 }
 0x700   :  { %v3294_v19 = vmul.f32 0.70710677, %v3283_v14  ;;  %v3303_v24 = vmul.f32 0.70710677, %v3291_v18  ;;  %v1375_v42 = vpop.f32.mrf.mxu0 }
 0x701   :  { %v1501_v20 = vmul.f32 3.8918573e-05, %v3285_v16  ;;  %v1490_v21 = vmul.f32 2.1237322e-06, %v3285_v16  ;;  %v1530_v22 = vmul.f32 2.1237322e-06, %v3287_v17  ;;  %v3321_v52 = vadd.f32 %v1375_v42, %v1170_v61 }
 0x702   :  { %v1541_v6 = vmul.f32 3.8918573e-05, %v3287_v17  ;;  %v1408_v31 = vmul.f32 %v3294_v19, %v3294_v19  ;;  %v1448_v34 = vmul.f32 %v3303_v24, %v3303_v24 }
 0x703   :  { %v1502_v23 = vadd.f32 0.001143296, %v1501_v20  ;;  %v1491_v28 = vadd.f32 0.00028619796, %v1490_v21  ;;  %v1531_v29 = vadd.f32 0.00028619796, %v1530_v22  ;;  %v1389_v20 = vpop.f32.mrf.mxu1 }
 0x704   :  { %v1542_v25 = vadd.f32 0.001143296, %v1541_v6  ;;  %v3305_v26 = vmin.f32 %v1408_v31, 16.0  ;;  %v3317_v44 = vmin.f32 %v1448_v34, 16.0  ;;  %v3328_v11 = vmul.f32 0.70710677, %v3321_v52 }
 0x705   :  { %v1503_v27 = vmul.f32 %v1502_v23, %v3285_v16  ;;  %v1492_v38 = vmul.f32 %v1491_v28, %v3285_v16  ;;  %v1532_v39 = vmul.f32 %v1531_v29, %v3287_v17 }
 0x706   :  { %v1543_v30 = vmul.f32 %v1542_v25, %v3287_v17  ;;  %v1421_v32 = vmul.f32 3.8918573e-05, %v3305_v26  ;;  %v1410_v51 = vmul.f32 2.1237322e-06, %v3305_v26  ;;  %v1450_v1 = vmul.f32 2.1237322e-06, %v3317_v44 }
 0x707   :  { %v1504_v33 = vadd.f32 0.014752088, %v1503_v27  ;;  %v1493_v8 = vadd.f32 0.0036580483, %v1492_v38  ;;  %v1533_v0 = vadd.f32 0.0036580483, %v1532_v39  ;;  %v1648_v13 = vmul.f32 %v3328_v11, %v3328_v11 }
 0x708   :  { %v1544_v35 = vadd.f32 0.014752088, %v1543_v30  ;;  %v1422_v36 = vadd.f32 0.001143296, %v1421_v32  ;;  %v1411_v58 = vadd.f32 0.00028619796, %v1410_v51  ;;  %v3344_v27 = vadd.f32 %v1389_v20, %v1171_v62 }
 0x709   :  { %v1505_v37 = vmul.f32 %v1504_v33, %v3285_v16  ;;  %v1494_v59 = vmul.f32 %v1493_v8, %v3285_v16  ;;  %v1534_v60 = vmul.f32 %v1533_v0, %v3287_v17  ;;  %v1451_v54 = vadd.f32 0.00028619796, %v1450_v1 }
 0x70a   :  { %v1545_v40 = vmul.f32 %v1544_v35, %v3287_v17  ;;  %v1423_v41 = vmul.f32 %v1422_v36, %v3305_v26  ;;  %v1461_v63 = vmul.f32 3.8918573e-05, %v3317_v44  ;;  %v1412_v12 = vmul.f32 %v1411_v58, %v3305_v26 }
 0x70b   :  { %v1506_v43 = vadd.f32 0.112945676, %v1505_v37  ;;  %v1495_v21 = vadd.f32 0.05243302, %v1494_v59  ;;  %v1535_v22 = vadd.f32 0.05243302, %v1534_v60  ;;  %v1452_v31 = vmul.f32 %v1451_v54, %v3317_v44  ;;  %v1347_v37 = vpop.f32.mrf.mxu2 }
 0x70c   :  { %v1546_v45 = vadd.f32 0.112945676, %v1545_v40  ;;  %v1424_v47 = vadd.f32 0.014752088, %v1423_v41  ;;  %v1462_v23 = vadd.f32 0.001143296, %v1461_v63 }
 0x70d   :  { %v1507_v48 = vmul.f32 %v1506_v43, %v3285_v16  ;;  %v1413_v28 = vadd.f32 0.0036580483, %v1412_v12  ;;  %v3346_v29 = vmin.f32 %v1648_v13, 16.0  ;;  %v1496_v30 = vmul.f32 %v1495_v21, %v3285_v16 }
 0x70e   :  { %v1547_v50 = vmul.f32 %v1546_v45, %v3287_v17  ;;  %v1425_v56 = vmul.f32 %v1424_v47, %v3305_v26  ;;  %v1536_v32 = vmul.f32 %v1535_v22, %v3287_v17  ;;  %v1453_v34 = vadd.f32 0.0036580483, %v1452_v31 }
 0x70f   :  { %v1508_v55 = vadd.f32 0.4994258, %v1507_v48  ;;  %v1463_v35 = vmul.f32 %v1462_v23, %v3317_v44  ;;  %v1650_v36 = vmul.f32 2.1237322e-06, %v3346_v29  ;;  %v1661_v39 = vmul.f32 3.8918573e-05, %v3346_v29 }
 0x710   :  { %v1548_v61 = vadd.f32 0.4994258, %v1547_v50  ;;  %v1426_v10 = vadd.f32 0.112945676, %v1425_v56  ;;  %v3356_v62 = vmul.f32 0.70710677, %v3344_v27  ;;  %v1414_v40 = vmul.f32 %v1413_v28, %v3305_v26 }
 0x711   :  { %v1509_v57 = vmul.f32 %v1508_v55, %v3285_v16  ;;  %v1497_v42 = vadd.f32 0.18741608, %v1496_v30  ;;  %v3363_v43 = vadd.f32 %v1347_v37, %v1168_v3  ;;  %v1537_v45 = vadd.f32 0.18741608, %v1536_v32 }
 0x712   :  { %v1549_v6 = vmul.f32 %v1548_v61, %v3287_v17  ;;  %v1427_v25 = vmul.f32 %v1426_v10, %v3305_v26  ;;  %v1454_v47 = vmul.f32 %v1453_v34, %v3317_v44  ;;  %v1464_v48 = vadd.f32 0.014752088, %v1463_v35 }
 0x713   :  { %v3333_v9 = vadd.f32 1.0, %v1509_v57  ;;  %v1651_v51 = vadd.f32 0.00028619796, %v1650_v36  ;;  %v1662_v0 = vadd.f32 0.001143296, %v1661_v39  ;;  %v1688_v55 = vmul.f32 %v3356_v62, %v3356_v62 }
 0x714   :  { %v3350_v33 = vadd.f32 1.0, %v1549_v6  ;;  %v1428_v38 = vadd.f32 0.4994258, %v1427_v25  ;;  %v1415_v1 = vadd.f32 0.05243302, %v1414_v40  ;;  %v1498_v3 = vmul.f32 %v1497_v42, %v3285_v16 }
 0x715   :  { %2681 = vrcp.f32 %v3333_v9  ;;  %v1652_v56 = vmul.f32 %v1651_v51, %v3346_v29  ;;  %v1538_v57 = vmul.f32 %v1537_v45, %v3287_v17  ;;  %v1455_v58 = vadd.f32 0.05243302, %v1454_v47  ;;  %v2587_v45 = vld [vmem:[#allocation17 + $0xb8] sm:$0xff] }
 0x716   :  { %2683 = vrcp.f32 %v3350_v33  ;;  %v1429_v8 = vmul.f32 %v1428_v38, %v3305_v26  ;;  %v1663_v59 = vmul.f32 %v1662_v0, %v3346_v29  ;;  %v1465_v61 = vmul.f32 %v1464_v48, %v3317_v44  ;;  %v2595_v47 = vld [vmem:[#allocation17 + $0xf8] sm:$0xff]  ;;  %2036 = vmatpush.bf16.msra.mxu0 %v2587_v45  ;;  %v1361_v45 = vpop.f32.mrf.mxu3 }
 0x717   :  { %v3379_v54 = vmin.f32 %v1688_v55, 16.0  ;;  %v3382_v63 = vmul.f32 0.70710677, %v3363_v43  ;;  %v3385_v10 = vmul.f32 0.5, %v3263_v2  ;;  %v1416_v12 = vmul.f32 %v1415_v1, %v3305_v26  ;;  %2050 = vmatpush.bf16.msrb.mxu1 %v2595_v47  ;;  %v2585_v47 = vld [vmem:[#allocation17 + $0xa8] sm:$0xff] }
 0x718   :  { %v3376_v60 = vadd.f32 1.0, %v1429_v8  ;;  %v1499_v17 = vadd.f32 1.1283791, %v1498_v3  ;;  %v3391_v20 = vmul.f32 0.5, %v3267_v15  ;;  %v3394_v21 = vmul.f32 0.5, %v3321_v52 }
 0x719   :  { %v1653_v22 = vadd.f32 0.0036580483, %v1652_v56  ;;  %v1520_v6 = vand.u32 2147483647, %v3333_v9  ;;  %v1539_v31 = vadd.f32 1.1283791, %v1538_v57  ;;  %v3398_v23 = vmul.f32 %v1455_v58, %v3317_v44 }
 0x71a   :  { %v1664_v2 = vadd.f32 0.014752088, %v1663_v59  ;;  %2685 = vrcp.f32 %v3376_v60  ;;  %v1466_v25 = vadd.f32 0.112945676, %v1465_v61  ;;  %v1690_v28 = vmul.f32 2.1237322e-06, %v3379_v54 }
 0x71b   :  { %v3359_v41 = vpop.eup %2681  ;;  %v1568_v15 = vmul.f32 %v3382_v63, %v3382_v63  ;;  %v1417_v32 = vadd.f32 0.18741608, %v1416_v12  ;;  %v3409_v35 = vmul.f32 %v1499_v17, %v3271_v4  ;;  %v1654_v36 = vmul.f32 %v1653_v22, %v3346_v29  ;;  %v2586_v12 = vld [vmem:[#allocation17 + $0xb0] sm:$0xff] }
 0x71c   :  { %v1512_v50 = vmul.f32 %v3359_v41, %v3333_v9  ;;  %v3388_v13 = vpop.eup %2683  ;;  %v1665_v34 = vmul.f32 %v1664_v2, %v3346_v29  ;;  %v1701_v37 = vmul.f32 3.8918573e-05, %v3379_v54  ;;  %vm1516_vm2 = vweird.f32 %v3333_v9  ;;  %2037 = vmatpush.bf16.msra.mxu0 %v2586_v12 }
 0x71d   :  { %v1552_v52 = vmul.f32 %v3388_v13, %v3350_v33  ;;  %v3413_v38 = vmin.f32 %v1568_v15, 16.0  ;;  %v1522_v39 = vand.u32 2147483648, %v3333_v9  ;;  %v3418_v40 = vmul.f32 %v1539_v31, %v3274_v5  ;;  %v2594_v9 = vld [vmem:[#allocation17 + $0xf0] sm:$0xff] }
 0x71e   :  { %v1513_v16 = vsub.f32 1.0, %v1512_v50  ;;  %v1691_v42 = vadd.f32 0.00028619796, %v1690_v28  ;;  %vm3420_vm3 = vcmp.eq.f32.partialorder %v1520_v6, 8.507059e+37  ;;  %v1560_v4 = vand.u32 2147483647, %v3350_v33  ;;  %2051 = vmatpush.bf16.msrb.mxu1 %v2594_v9 }
 0x71f   :  { %v1467_v51 = vmul.f32 %v1466_v25, %v3317_v44  ;;  %v1666_v8 = vadd.f32 0.112945676, %v1665_v34  ;;  %vm1517_vm4 = vweird.f32 %v3359_v41  ;;  %v1553_v55 = vsub.f32 1.0, %v1552_v52  ;;  %v2579_v52 = vld [vmem:[#allocation17 + $0x78] sm:$0xff] }
 0x720   :  { %v1514_v30 = vmul.f32 %v3359_v41, %v1513_v16  ;;  %v1562_v5 = vand.u32 2147483648, %v3350_v33  ;;  %v3429_v50 = vpop.eup %2685  ;;  %v1655_v1 = vadd.f32 0.05243302, %v1654_v36  ;;  %v1702_v56 = vadd.f32 0.001143296, %v1701_v37  ;;  %vm3441_vm6 = vmor %vm1516_vm2, %vm1517_vm4  ;;  %2022 = vmatpush.bf16.msrb.mxu3 %v2579_v52  ;;  %2038 = vmatpush.bf16.msra.mxu0 %v2585_v47  ;;  %v2577_v52 = vld [vmem:[#allocation17 + $0x68] sm:$0xff] }
 0x721   :  { %v1667_v3 = vmul.f32 %v1666_v8, %v3346_v29  ;;  %v1570_v57 = vmul.f32 2.1237322e-06, %v3413_v38  ;;  %v1523_v58 = vor.u32 1.1754944e-38, %v1522_v39  ;;  %vm1556_vm5 = vweird.f32 %v3350_v33 }
 0x722   :  { %v1515_v0 = vadd.f32 %v3359_v41, %v1514_v30  ;;  %v1418_v59 = vmul.f32 %v1417_v32, %v3305_v26  ;;  %v1692_v61 = vmul.f32 %v1691_v42, %v3379_v54  ;;  %v1581_v16 = vmul.f32 3.8918573e-05, %v3413_v38  ;;  %v2571_v30 = vld [vmem:[#allocation17 + $0x38] sm:$0xff] }
 0x723   :  { %v1468_v22 = vadd.f32 0.4994258, %v1467_v51  ;;  %v1668_v6 = vadd.f32 0.4994258, %v1667_v3  ;;  %v1703_v31 = vmul.f32 %v1702_v56, %v3379_v54  ;;  %v1571_v2 = vadd.f32 0.00028619796, %v1570_v57  ;;  %2008 = vmatpush.bf16.msra.mxu2 %v2571_v30 }
 0x724   :  { %v1519_v26 = vsel %vm3441_vm6, %v3359_v41, %v1515_v0  ;;  %v1554_v25 = vmul.f32 %v3388_v13, %v1553_v55  ;;  %v1432_v28 = vmul.f32 %v3429_v50, %v3376_v60  ;;  %v1582_v15 = vadd.f32 0.001143296, %v1581_v16  ;;  %v2593_v51 = vld [vmem:[#allocation17 + $0xe8] sm:$0xff]  ;;  %v2578_v16 = vld [vmem:[#allocation17 + $0x70] sm:$0xff] }
 0x725   :  { %v1656_v32 = vmul.f32 %v1655_v1, %v3346_v29  ;;  %v1669_v34 = vmul.f32 %v1668_v6, %v3346_v29  ;;  %v1704_v36 = vadd.f32 0.014752088, %v1703_v31  ;;  %v1572_v37 = vmul.f32 %v1571_v2, %v3413_v38  ;;  %2052 = vmatpush.bf16.msrb.mxu1 %v2593_v51  ;;  %v2584_v2 = vld [vmem:[#allocation17 + $0xa0] sm:$0xff]  ;;  %2023 = vmatpush.bf16.msrb.mxu3 %v2578_v16  ;;  %v2569_v30 = vld [vmem:[#allocation17 + $0x28] sm:$0xff] }
 0x726   :  { %vm1557_vm7 = vweird.f32 %v3388_v13  ;;  %vm3456_vm8 = vcmp.eq.f32.partialorder %v1560_v4, 8.507059e+37  ;;  %v1693_v39 = vadd.f32 0.0036580483, %v1692_v61  ;;  %v1583_v42 = vmul.f32 %v1582_v15, %v3413_v38  ;;  %v2570_v61 = vld [vmem:[#allocation17 + $0x30] sm:$0xff]  ;;  %2039 = vmatpush.bf16.msra.mxu0 %v2584_v2 }
 0x727   :  { %v1442_v8 = vand.u32 2147483648, %v3376_v60  ;;  %v1469_v0 = vmul.f32 %v1468_v22, %v3317_v44  ;;  %v3463_v55 = vadd.f32 1.0, %v1669_v34  ;;  %v1705_v1 = vmul.f32 %v1704_v36, %v3379_v54  ;;  %2009 = vmatpush.bf16.msra.mxu2 %v2570_v61  ;;  %vm3481_vm9 = vmor %vm1556_vm5, %vm1557_vm7  ;;  %v2582_v2 = vld [vmem:[#allocation17 + $0x90] sm:$0xff] }
 0x728   :  { %v1524_v4 = vsel %vm3420_vm3, %v1523_v58, %v1519_v26  ;;  %v1555_v3 = vadd.f32 %v3388_v13, %v1554_v25  ;;  %v1573_v56 = vadd.f32 0.0036580483, %v1572_v37  ;;  %v1584_v57 = vadd.f32 0.014752088, %v1583_v42  ;;  %v2592_v25 = vld [vmem:[#allocation17 + $0xe0] sm:$0xff]  ;;  %v2591_v42 = vld [vmem:[#allocation17 + $0xd8] sm:$0xff] }
 0x729   :  { %v1433_v12 = vsub.f32 1.0, %v1432_v28  ;;  %v1657_v17 = vadd.f32 0.18741608, %v1656_v32  ;;  %2687 = vrcp.f32 %v3463_v55  ;;  %v3472_v22 = vadd.f32 %v1361_v45, %v1169_v7  ;;  %2053 = vmatpush.bf16.msrb.mxu1 %v2592_v25  ;;  %2024 = vmatpush.bf16.msrb.mxu3 %v2577_v52  ;;  %v2590_v26 = vld [vmem:[#allocation17 + $0xd0] sm:$0xff]  ;;  %v2575_v52 = vld [vmem:[#allocation17 + $0x58] sm:$0xff] }
 0x72a   :  { %v1563_v6 = vor.u32 1.1754944e-38, %v1562_v5  ;;  %v3474_v31 = vadd.f32 1.1283791, %v1418_v59  ;;  %v1694_v48 = vmul.f32 %v1693_v39, %v3379_v54  ;;  %v1706_v58 = vadd.f32 0.112945676, %v1705_v1  ;;  %v2583_v39 = vld [vmem:[#allocation17 + $0x98] sm:$0xff] }
 0x72b   :  { %v1440_v53 = vand.u32 2147483647, %v3376_v60  ;;  %v3486_v7 = vor.u32 1.1754944e-38, %v1442_v8  ;;  %v3488_v5 = vadd.f32 1.0, %v1469_v0  ;;  %v1585_v59 = vmul.f32 %v1584_v57, %v3413_v38  ;;  %2010 = vmatpush.bf16.msra.mxu2 %v2569_v30  ;;  %2040 = vmatpush.bf16.msra.mxu0 %v2583_v39  ;;  %v2567_v30 = vld [vmem:[#allocation17 + $0x18] sm:$0xff]  ;;  %v2588_v0 = vld [vmem:[#allocation17 + $0xc0] sm:$0xff] }
 0x72c   :  { %v3492_v28 = vmul.f32 %v1524_v4, %v3409_v35  ;;  %v1559_v33 = vsel %vm3481_vm9, %v3388_v13, %v1555_v3  ;;  %v1707_v15 = vmul.f32 %v1706_v58, %v3379_v54  ;;  %v1574_v9 = vmul.f32 %v1573_v56, %v3413_v38  ;;  %v2568_v3 = vld [vmem:[#allocation17 + $0x20] sm:$0xff] }
 0x72d   :  { %v1434_v32 = vmul.f32 %v3429_v50, %v1433_v12  ;;  %v1658_v34 = vmul.f32 %v1657_v17, %v3346_v29  ;;  %v1586_v36 = vadd.f32 0.112945676, %v1585_v59  ;;  %v3502_v37 = vmul.f32 0.70710677, %v3472_v22  ;;  %v2576_v56 = vld [vmem:[#allocation17 + $0x60] sm:$0xff]  ;;  %2054 = vmatpush.bf16.msrb.mxu1 %v2591_v42 }
 0x72e   :  { %vm1436_vm10 = vweird.f32 %v3376_v60  ;;  %vm1437_vm11 = vweird.f32 %v3429_v50  ;;  %v1695_v13 = vadd.f32 0.05243302, %v1694_v48  ;;  %v1708_v35 = vadd.f32 0.4994258, %v1707_v15  ;;  %2025 = vmatpush.bf16.msrb.mxu3 %v2576_v56 }
 0x72f   :  { %v3506_v45 = vpop.eup %2687  ;;  %v1564_v47 = vsel %vm3456_vm8, %v1563_v6, %v1559_v33  ;;  %2689 = vrcp.f32 %v3488_v5  ;;  %v1587_v29 = vmul.f32 %v1586_v36, %v3413_v38  ;;  %v1608_v51 = vmul.f32 %v3502_v37, %v3502_v37  ;;  %2011 = vmatpush.bf16.msra.mxu2 %v2568_v3  ;;  %vm3537_vm13 = vmor %vm1436_vm10, %vm1437_vm11  ;;  %2041 = vmatpush.bf16.msra.mxu0 %v2582_v2  ;;  %v2574_v3 = vld [vmem:[#allocation17 + $0x50] sm:$0xff] }
 0x730   :  { %v2366_v8 = vclamps-f32 %v3492_v28, 1.0  ;;  %vm3515_vm12 = vcmp.eq.f32.partialorder %v1440_v53, 8.507059e+37  ;;  %v1672_v1 = vmul.f32 %v3506_v45, %v3463_v55  ;;  %v1709_v41 = vmul.f32 %v1708_v35, %v3379_v54 }
 0x731   :  { %v1575_v4 = vadd.f32 0.05243302, %v1574_v9  ;;  %v1435_v57 = vadd.f32 %v3429_v50, %v1434_v32  ;;  %v1659_v61 = vadd.f32 1.1283791, %v1658_v34  ;;  %v1588_v16 = vadd.f32 0.4994258, %v1587_v29  ;;  %2055 = vmatpush.bf16.msrb.mxu1 %v2590_v26 }
 0x732   :  { %v3523_v12 = vmin.f32 %v1608_v51, 16.0  ;;  %v1673_v17 = vsub.f32 1.0, %v1672_v1  ;;  %v1680_v6 = vand.u32 2147483647, %v3463_v55  ;;  %v1696_v48 = vmul.f32 %v1695_v13, %v3379_v54  ;;  %v2581_v29 = vld [vmem:[#allocation17 + $0x88] sm:$0xff]  ;;  %2026 = vmatpush.bf16.msrb.mxu3 %v2575_v52 }
 0x733   :  { %v3527_v58 = vadd.f32 1.0, %v1709_v41  ;;  %v1682_v53 = vand.u32 2147483648, %v3463_v55  ;;  %v1589_v59 = vmul.f32 %v1588_v16, %v3413_v38  ;;  %vm1677_vm14 = vweird.f32 %v3506_v45  ;;  %2012 = vmatpush.bf16.msra.mxu2 %v2567_v30  ;;  %v2589_v51 = vld [vmem:[#allocation17 + $0xc8] sm:$0xff]  ;;  %2042 = vmatpush.bf16.msra.mxu0 %v2581_v29 }
 0x734   :  { %v1610_v25 = vmul.f32 2.1237322e-06, %v3523_v12  ;;  %v1621_v28 = vmul.f32 3.8918573e-05, %v3523_v12  ;;  %v1674_v15 = vmul.f32 %v3506_v45, %v1673_v17  ;;  %v1576_v9 = vmul.f32 %v1575_v4, %v3413_v38  ;;  %v2566_v4 = vld [vmem:[#allocation17 + $0x10] sm:$0xff] }
 0x735   :  { %2691 = vrcp.f32 %v3527_v58  ;;  %v3545_v32 = vpop.eup %2689  ;;  %v3548_v34 = vmul.f32 %v1564_v47, %v3418_v40  ;;  %v1439_v60 = vsel %vm3537_vm13, %v3429_v50, %v1435_v57  ;;  %v3553_v36 = vadd.f32 1.0, %v1589_v59  ;;  %2056 = vmatpush.bf16.msrb.mxu1 %v2589_v51  ;;  %v2564_v51 = vld [vmem:[#allocation17] sm:$0xff] }
 0x736   :  { %v1611_v13 = vadd.f32 0.00028619796, %v1610_v25  ;;  %v1675_v35 = vadd.f32 %v3506_v45, %v1674_v15  ;;  %vm1676_vm15 = vweird.f32 %v3463_v55  ;;  %v1697_v39 = vadd.f32 0.18741608, %v1696_v48  ;;  %2027 = vmatpush.bf16.msrb.mxu3 %v2574_v3  ;;  %v2573_v25 = vld [vmem:[#allocation17 + $0x48] sm:$0xff] }
 0x737   :  { %v1622_v42 = vadd.f32 0.001143296, %v1621_v28  ;;  %v1730_v1 = vadd.f32 1.0, %v2366_v8  ;;  %v1660_v40 = vmul.f32 %v1659_v61, %v3328_v11  ;;  %vm1678_vm0 = vmor %vm1676_vm15, %vm1677_vm14  ;;  %v1683_v50 = vor.u32 1.1754944e-38, %v1682_v53  ;;  %2013 = vmatpush.bf16.msra.mxu2 %v2566_v4 }
 0x738   :  { %2693 = vrcp.f32 %v3553_v36  ;;  %v1679_v47 = vsel %vm1678_vm0, %v3506_v45, %v1675_v35  ;;  %vm1681_vm1 = vcmp.eq.f32.partialorder %v1680_v6, 8.507059e+37  ;;  %v1577_v55 = vadd.f32 0.18741608, %v1576_v9 }
 0x739   :  { %v1612_v41 = vmul.f32 %v1611_v13, %v3523_v12  ;;  %v1444_v11 = vsel %vm3515_vm12, %v3486_v7, %v1439_v60  ;;  %v3568_v8 = vmul.f32 %v3545_v32, %v3488_v5  ;;  %v1684_v56 = vsel %vm1681_vm1, %v1683_v50, %v1679_v47  ;;  %v2580_v7 = vld [vmem:[#allocation17 + $0x80] sm:$0xff]  ;;  %2057 = vmatpush.bf16.msrb.mxu1 %v2588_v0 }
 0x73a   :  { %v1623_v57 = vmul.f32 %v1622_v42, %v3523_v12  ;;  %v1420_v45 = vmul.f32 %v3474_v31, %v3294_v19  ;;  %v3574_v16 = vadd.f32 0.18741608, %v3398_v23  ;;  %v1685_v17 = vmul.f32 %v1684_v56, %v1660_v40  ;;  %2043 = vmatpush.bf16.msra.mxu0 %v2580_v7  ;;  %2028 = vmatpush.bf16.msrb.mxu3 %v2573_v25 }
 0x73b   :  { %v2692_v61 = vpop.eup %2691  ;;  %v1698_v6 = vmul.f32 %v1697_v39, %v3379_v54  ;;  %v1738_v48 = vmul.f32 %v1730_v1, %v3385_v10  ;;  %v2367_v2 = vclamps-f32 %v3548_v34, 1.0  ;;  %v1578_v23 = vmul.f32 %v1577_v55, %v3413_v38  ;;  %v2565_v54 = vld [vmem:[#allocation17 + $0x8] sm:$0xff]  ;;  %v2572_v1 = vld [vmem:[#allocation17 + $0x40] sm:$0xff] }
 0x73c   :  { %v1712_v26 = vmul.f32 %v2692_v61, %v3527_v58  ;;  %v1624_v53 = vadd.f32 0.014752088, %v1623_v57  ;;  %v3580_v59 = vmul.f32 %v1444_v11, %v1420_v45  ;;  %v2370_v19 = vclamps-f32 %v1685_v17, 1.0  ;;  %2014 = vmatpush.bf16.msra.mxu2 %v2565_v54 }
 0x73d   :  { %v1613_v31 = vadd.f32 0.0036580483, %v1612_v41  ;;  %v1473_v33 = vsub.f32 1.0, %v3568_v8  ;;  %v1722_v10 = vand.u32 2147483648, %v3527_v58  ;;  %v1699_v52 = vadd.f32 1.1283791, %v1698_v6 }
 0x73e   :  { %v2694_v28 = vpop.eup %2693  ;;  %v1713_v15 = vsub.f32 1.0, %v1712_v26  ;;  %v1625_v9 = vmul.f32 %v1624_v53, %v3523_v12  ;;  %v1734_v30 = vadd.f32 1.0, %v2370_v19  ;;  %vm1716_vm2 = vweird.f32 %v3527_v58  ;;  %2029 = vmatpush.bf16.msrb.mxu3 %v2572_v1 }
 0x73f   :  { %v1592_v34 = vmul.f32 %v2694_v28, %v3553_v36  ;;  %vm1717_vm3 = vweird.f32 %v2692_v61  ;;  %v1720_v60 = vand.u32 2147483647, %v3527_v58  ;;  %v1579_v39 = vadd.f32 1.1283791, %v1578_v23 }
 0x740   :  { %v1714_v38 = vmul.f32 %v2692_v61, %v1713_v15  ;;  %v1626_v13 = vadd.f32 0.112945676, %v1625_v9  ;;  %v1742_v35 = vmul.f32 %v1734_v30, %v3394_v21  ;;  %v1614_v29 = vmul.f32 %v1613_v31, %v3523_v12  ;;  %vm1718_vm4 = vmor %vm1716_vm2, %vm1717_vm3  ;;  %2015 = vmatpush.bf16.msra.mxu2 %v2564_v51 }
 0x741   :  { %v1593_v42 = vsub.f32 1.0, %v1592_v34  ;;  %v1723_v50 = vor.u32 1.1754944e-38, %v1722_v10  ;;  %v1602_v47 = vand.u32 2147483648, %v3553_v36  ;;  %vm1597_vm5 = vweird.f32 %v2694_v28 }
 0x742   :  { %v1715_v40 = vadd.f32 %v2692_v61, %v1714_v38  ;;  %v1627_v55 = vmul.f32 %v1626_v13, %v3523_v12  ;;  %v1746_v41 = vpack.c.bf16 %v1742_v35, %v1738_v48  ;;  %v1600_v21 = vand.u32 2147483647, %v3553_v36 }
 0x743   :  { %v1594_v4 = vmul.f32 %v2694_v28, %v1593_v42  ;;  %v1700_v3 = vmul.f32 %v1699_v52, %v3356_v62  ;;  %vm1721_vm6 = vcmp.eq.f32.partialorder %v1720_v60, 8.507059e+37  ;;  %vm1596_vm7 = vweird.f32 %v3553_v36 }
 0x744   :  { %v1719_v11 = vsel %vm1718_vm4, %v2692_v61, %v1715_v40  ;;  %v1628_v8 = vadd.f32 0.4994258, %v1627_v55  ;;  %v1615_v45 = vadd.f32 0.05243302, %v1614_v29  ;;  %2044 = vmatmul.bf16.vlgmr.msra.gmra.mxu0 %v1746_v41  ;;  %v1474_v58 = vmul.f32 %v3545_v32, %v1473_v33  ;;  %vm1598_vm8 = vmor %vm1596_vm7, %vm1597_vm5 }
 0x745   :  { %v1724_v56 = vsel %vm1721_vm6, %v1723_v50, %v1719_v11  ;;  %v1595_v57 = vadd.f32 %v2694_v28, %v1594_v4  ;;  %v1603_v6 = vor.u32 1.1754944e-38, %v1602_v47  ;;  %v2364_v62 = vclamps-f32 %v3580_v59, 1.0 }
 0x746   :  { %v1725_v17 = vmul.f32 %v1724_v56, %v1700_v3  ;;  %v1629_v7 = vmul.f32 %v1628_v8, %v3523_v12  ;;  %v1580_v61 = vmul.f32 %v1579_v39, %v3382_v63  ;;  %vm1601_vm9 = vcmp.eq.f32.partialorder %v1600_v21, 8.507059e+37 }
 0x747   :  { %v1599_v0 = vsel %vm1598_vm8, %v2694_v28, %v1595_v57  ;;  %v1731_v48 = vadd.f32 1.0, %v2367_v2  ;;  %v1458_v19 = vmul.f32 %v3574_v16, %v3317_v44  ;;  %v1399_v23 = vmul.f32 0.5, %v3344_v27 }
 0x748   :  { %v2371_v26 = vclamps-f32 %v1725_v17, 1.0  ;;  %v1604_v53 = vsel %vm1601_vm9, %v1603_v6, %v1599_v0  ;;  %v1630_v36 = vadd.f32 1.0, %v1629_v7  ;;  %v1616_v54 = vmul.f32 %v1615_v45, %v3523_v12 }
 0x749   :  { %v1605_v31 = vmul.f32 %v1604_v53, %v1580_v61  ;;  %v1475_v25 = vadd.f32 %v3545_v32, %v1474_v58  ;;  %vm1477_vm10 = vweird.f32 %v3545_v32  ;;  %v1728_v63 = vadd.f32 1.0, %v2364_v62 }
 0x74a   :  { %v1735_v59 = vadd.f32 1.0, %v2371_v26  ;;  %2695 = vrcp.f32 %v1630_v36  ;;  %v1482_v2 = vand.u32 2147483648, %v3488_v5  ;;  %v1739_v33 = vmul.f32 %v1731_v48, %v3391_v20 }
 0x74b   :  { %v2368_v28 = vclamps-f32 %v1605_v31, 1.0  ;;  %vm1476_vm11 = vweird.f32 %v3488_v5  ;;  %v1480_v44 = vand.u32 2147483647, %v3488_v5  ;;  %v1392_v16 = vmul.f32 0.5, %v3283_v14 }
 0x74c   :  { %v1743_v27 = vmul.f32 %v1735_v59, %v1399_v23  ;;  %vm1478_vm12 = vmor %vm1476_vm11, %vm1477_vm10  ;;  %v1396_v15 = vmul.f32 0.5, %v3363_v43  ;;  %v1617_v9 = vadd.f32 0.18741608, %v1616_v54  ;;  %v1459_v30 = vadd.f32 1.1283791, %v1458_v19 }
 0x74d   :  { %v1732_v10 = vadd.f32 1.0, %v2368_v28  ;;  %v1479_v52 = vsel %vm1478_vm12, %v3545_v32, %v1475_v25  ;;  %v1736_v38 = vmul.f32 %v1728_v63, %v1392_v16  ;;  %v1483_v60 = vor.u32 1.1754944e-38, %v1482_v2 }
 0x74e   :  { %v1747_v34 = vpack.c.bf16 %v1743_v27, %v1739_v33  ;;  %vm1481_vm13 = vcmp.eq.f32.partialorder %v1480_v44, 8.507059e+37  ;;  %v1618_v39 = vmul.f32 %v1617_v9, %v3523_v12  ;;  %v1460_v42 = vmul.f32 %v1459_v30, %v3303_v24 }
 0x74f   :  { %v1740_v13 = vmul.f32 %v1732_v10, %v1396_v15  ;;  %v1484_v35 = vsel %vm1481_vm13, %v1483_v60, %v1479_v52  ;;  %v1642_v51 = vand.u32 2147483648, %v1630_v36  ;;  %v1640_v40 = vand.u32 2147483647, %v1630_v36 }
 0x750   :  { %v2696_v20 = vpop.eup %2695  ;;  %2058 = vmatmul.bf16.vlgmr.msrb.gmra.mxu1 %v1747_v34  ;;  %v1485_v29 = vmul.f32 %v1484_v35, %v1460_v42  ;;  %v1619_v1 = vadd.f32 1.1283791, %v1618_v39  ;;  %vm1636_vm15 = vweird.f32 %v1630_v36  ;;  %v1393_v11 = vmul.f32 0.5, %v3291_v18 }
 0x751   :  { %v1744_v5 = vpack.c.bf16 %v1740_v13, %v1736_v38  ;;  %v1632_v14 = vmul.f32 %v2696_v20, %v1630_v36  ;;  %vm1637_vm14 = vweird.f32 %v2696_v20  ;;  %v1643_v47 = vor.u32 1.1754944e-38, %v1642_v51 }
 0x752   :  { %vm1638_vm0 = vmor %vm1636_vm15, %vm1637_vm14  ;;  %v2365_v55 = vclamps-f32 %v1485_v29, 1.0  ;;  %v1620_v41 = vmul.f32 %v1619_v1, %v3502_v37  ;;  %vm1641_vm1 = vcmp.eq.f32.partialorder %v1640_v40, 8.507059e+37  ;;  %v1397_v8 = vmul.f32 0.5, %v3472_v22  ;;  %v2638_v37 = vld [vmem:[%s3645_s12] ss:$0 sm:$0xff] }
 0x753   :  { %v1633_v43 = vsub.f32 1.0, %v1632_v14  ;;  %2016 = vmatmul.bf16.vlgmr.msra.gmra.mxu2 %v1744_v5 }
 0x754   :  { %v1729_v24 = vadd.f32 1.0, %v2365_v55 }
 0x755   :  { %v1634_v32 = vmul.f32 %v2696_v20, %v1633_v43 }
 0x756   :  { %v1737_v57 = vmul.f32 %v1729_v24, %v1393_v11 }
 0x757   :  { %v1635_v50 = vadd.f32 %v2696_v20, %v1634_v32 }
 0x759   :  { %v1639_v4 = vsel %vm1638_vm0, %v2696_v20, %v1635_v50 }
 0x75a   :  { %v1644_v12 = vsel %vm1641_vm1, %v1643_v47, %v1639_v4 }
 0x75b   :  { %v1645_v21 = vmul.f32 %v1644_v12, %v1620_v41 }
 0x75d   :  { %v2369_v3 = vclamps-f32 %v1645_v21, 1.0 }
 0x75f   :  { %v1733_v56 = vadd.f32 1.0, %v2369_v3 }
 0x761   :  { %v1741_v45 = vmul.f32 %v1733_v56, %v1397_v8 }
 0x763   :  { %v1745_v58 = vpack.c.bf16 %v1741_v45, %v1737_v57 }
 0x765   :  { %2030 = vmatmul.bf16.vlgmr.msrb.gmra.mxu3 %v1745_v58 }
 0x7c1   :  { %v2045_v7 = vpop.f32.mrf.mxu0 }
 0x7c9   :  { %v2047_v23 = vpop.f32.mrf.mxu0 }
 0x7cd   :  { %v2059_v0 = vpop.f32.mrf.mxu1 }
 0x7d5   :  { %v2061_v54 = vpop.f32.mrf.mxu1 }
 0x7d6   :  { %v2017_v17 = vpop.f32.mrf.mxu2 }
 0x7d7   :  { %v2018_v6 = vadd.f32 %v2638_v37, %v2017_v17 }
 0x7de   :  { %v2019_v48 = vpop.f32.mrf.mxu2 }
 0x7df   :  { %v2020_v53 = vadd.f32 %v2638_v37, %v2019_v48 }
 0x7e8   :  { %v2031_v62 = vpop.f32.mrf.mxu3 }
 0x7e9   :  { %v2032_v61 = vadd.f32 %v2031_v62, %v2018_v6 }
 0x7eb   :  { %v2046_v26 = vadd.f32 %v2045_v7, %v2032_v61 }
 0x7ed   :  { %v2060_v18 = vadd.f32 %v2059_v0, %v2046_v26 }
 0x7ef   :  { %v2064_v22 = vadd.f32 %v2060_v18, %v3233_v46 }
 0x7f0   :  { %v2033_v36 = vpop.f32.mrf.mxu3 }
 0x7f1   :  { %2066 = vst [vmem:[#allocation19] sm:$0xff] %v2064_v22  ;;  %v2034_v19 = vadd.f32 %v2033_v36, %v2020_v53 }
 0x7f3   :  { %v2048_v31 = vadd.f32 %v2047_v23, %v2034_v19 }
 0x7f5   :  { %v2062_v25 = vadd.f32 %v2061_v54, %v2048_v31 }
 0x7f7   :  { %v2065_v59 = vadd.f32 %v2062_v25, %v3237_v49 }
 0x7f9   :  { %2067 = vst [vmem:[#allocation19 + $0x8] sm:$0xff] %v2065_v59 }
 0x7fa   :  { %2080 = dma.vmem_to_hbm [thread:$0]  %s2073_s24, 256, %s2075_s3, [#allocation4], %s2982_s18, %s2982_s18, %s2983_s8  }
 0x7fb   :  { %2973 = dma.done.wait [#allocation4], 256  }
 0x7fc   :  { %2974 = vsyncadd [#allocation4], 4294967040 }
 0x7fd   :  { %2085 = vsyncpa [#allocation3], 1 }
 0x7fe   :  { %2086 = vsyncpa [#allocation6], 1 }
 0x7ff   :  { %2087 = vsyncpa [#allocation9], 1 }
 0x800   :  { %2088 = vsyncpa [#allocation12], 1 }
 0x801   :  { %2089 = vsyncpa [#allocation15], 1 }
 0x802   :  { %2090 = vsyncpa [#allocation18], 1 }
 0x803   :  { %2091 = vsyncpa [#allocation4], 1 }

</bundles_post_ra>
